<compile_context>
chip_gen: v6e
topology: v6e:2x2x1
jax: 0.10.0
libtpu: 0.0.40
codegen_flags: <defaults>
</compile_context>

<pallas_src>
import jax
import jax.numpy as jnp
from jax.experimental import pallas as pl
from jax.experimental.pallas import tpu as pltpu


# ----------------------------------------------------------------------------
# Fused kernel: both GCN layers + bias + ReLU, two-phase grid.
#   grid = (2, num_row_tiles)   (phase outer, row tile inner; row-major order)
# ----------------------------------------------------------------------------
def _fused_attr_decoder_kernel(a_ref, x_ref, w1_ref, b1_ref, w2_ref, b2_ref,
                               out_ref, xw1_s, h_s, hw2_s):
    p = pl.program_id(0)            # phase: 0 = layer 1, 1 = layer 2
    i = pl.program_id(1)            # row tile index
    tm = out_ref.shape[0]           # static block height
    row0 = pl.multiple_of(i * tm, tm)

    # ---- phase 0, first tile: hoist X @ W1 (reused by every row tile) ----
    @pl.when(jnp.logical_and(p == 0, i == 0))
    def _():
        xw1_s[...] = jnp.dot(
            x_ref[...], w1_ref[...], preferred_element_type=jnp.float32
        ).astype(xw1_s.dtype)

    # ---- phase 0: h_tile = relu(A_tile @ (X W1) + b1), kept in VMEM ----
    @pl.when(p == 0)
    def _():
        acc = jnp.dot(a_ref[...], xw1_s[...], preferred_element_type=jnp.float32)
        h_tile = jnp.maximum(acc + b1_ref[...], 0.0)
        h_s[pl.ds(row0, tm), :] = h_tile.astype(h_s.dtype)
        # Dropout (eval mode) is identity. Deterministic placeholder write;
        # this tile is fully overwritten in phase 1.
        out_ref[...] = jnp.zeros_like(out_ref)

    # ---- phase 1, first tile: hoist h @ W2 (h complete after phase 0) ----
    @pl.when(jnp.logical_and(p == 1, i == 0))
    def _():
        hw2_s[...] = jnp.dot(
            h_s[...], w2_ref[...], preferred_element_type=jnp.float32
        ).astype(hw2_s.dtype)

    # ---- phase 1: out_tile = relu(A_tile @ (h W2) + b2) ----
    @pl.when(p == 1)
    def _():
        acc = jnp.dot(a_ref[...], hw2_s[...], preferred_element_type=jnp.float32)
        out_ref[...] = jnp.maximum(acc + b2_ref[...], 0.0).astype(out_ref.dtype)


# ----------------------------------------------------------------------------
# Wrapper: pad to TPU-friendly shapes, cast MXU inputs to bf16, launch kernel.
# ----------------------------------------------------------------------------
def _round_up(v: int, m: int) -> int:
    return ((v + m - 1) // m) * m


def _pad2(a, rows, cols):
    return jnp.pad(a, ((0, rows - a.shape[0]), (0, cols - a.shape[1])))


def _vmem_bytes(n_pad: int, h_pad: int, f_pad: int, tm: int) -> int:
    bf = 2
    blocks = (2 * tm * n_pad * bf          # A row tile (double buffered)
              + 2 * n_pad * h_pad * bf     # X
              + 2 * h_pad * h_pad * bf     # W1
              + 2 * h_pad * f_pad * bf     # W2
              + 4 * (h_pad + f_pad) * 4    # biases
              + 2 * tm * f_pad * 4)        # output tile (double buffered)
    scratch = 2 * n_pad * h_pad * bf + n_pad * f_pad * bf
    return blocks + scratch


def attribute_decoder_apply(a_hat, x, params, *, tm: int = 256):
    n, nhid = x.shape
    nfeat = params["w2"].shape[1]

    tm = max(8, min(tm, _round_up(n, 8)))
    n_pad = _round_up(n, tm)
    h_pad = _round_up(nhid, 128)
    f_pad = _round_up(nfeat, 128)
    n_tiles = n_pad // tm

    bf16 = jnp.bfloat16
    a_p = _pad2(a_hat, n_pad, n_pad).astype(bf16)
    x_p = _pad2(x, n_pad, h_pad).astype(bf16)
    w1_p = _pad2(params["w1"], h_pad, h_pad).astype(bf16)
    w2_p = _pad2(params["w2"], h_pad, f_pad).astype(bf16)
    b1_p = _pad2(params["b1"].reshape(1, -1), 1, h_pad).astype(jnp.float32)
    b2_p = _pad2(params["b2"].reshape(1, -1), 1, f_pad).astype(jnp.float32)

    cost = pl.CostEstimate(
        flops=2 * (n_pad * h_pad * h_pad + n_pad * n_pad * h_pad
                   + n_pad * h_pad * f_pad + n_pad * n_pad * f_pad),
        transcendentals=0,
        bytes_accessed=int(2 * a_p.size * 2        # A_hat read once per phase (bf16)
                           + x_p.size * 2 + w1_p.size * 2 + w2_p.size * 2
                           + b1_p.size * 4 + b2_p.size * 4
                           + n_pad * f_pad * 4),   # output (f32)
    )

    vmem_limit = min(64 * 1024 * 1024,
                     max(32 * 1024 * 1024,
                         int(1.5 * _vmem_bytes(n_pad, h_pad, f_pad, tm))))

    out_padded = pl.pallas_call(
        _fused_attr_decoder_kernel,
        out_shape=jax.ShapeDtypeStruct((n_pad, f_pad), jnp.float32),
        grid=(2, n_tiles),
        in_specs=[
            pl.BlockSpec((tm, n_pad), lambda p, i: (i, 0)),      # A_hat row tile
            pl.BlockSpec((n_pad, h_pad), lambda p, i: (0, 0)),   # X
            pl.BlockSpec((h_pad, h_pad), lambda p, i: (0, 0)),   # W1
            pl.BlockSpec((1, h_pad), lambda p, i: (0, 0)),       # b1
            pl.BlockSpec((h_pad, f_pad), lambda p, i: (0, 0)),   # W2
            pl.BlockSpec((1, f_pad), lambda p, i: (0, 0)),       # b2
        ],
        out_specs=pl.BlockSpec((tm, f_pad), lambda p, i: (i, 0)),
        scratch_shapes=[
            pltpu.VMEM((n_pad, h_pad), bf16),   # X @ W1 (hoisted, bf16 for MXU)
            pltpu.VMEM((n_pad, h_pad), bf16),   # h = relu(layer 1) for all nodes
            pltpu.VMEM((n_pad, f_pad), bf16),   # h @ W2 (hoisted, bf16 for MXU)
        ],
        compiler_params=pltpu.CompilerParams(
            # Phase axis is sequential by construction; row axis must also be
            # "arbitrary" because phase 1 consumes the shared h scratch written
            # by every phase-0 tile (cannot be split across TensorCores).
            dimension_semantics=("arbitrary", "arbitrary"),
            vmem_limit_bytes=vmem_limit,
        ),
        cost_estimate=cost,
    )(a_p, x_p, w1_p, b1_p, w2_p, b2_p)

    return out_padded[:n, :nfeat]


# ----------------------------------------------------------------------------
# Glue: dense normalized adjacency from edge_index (plain JAX).
# Note: sums duplicate edges and adds +1 self-loops unconditionally (matches
# the JAX reference below; verify against torch_geometric gcn_norm for graphs
# that already contain self-loops / multi-edges).
# ----------------------------------------------------------------------------
def normalized_adjacency(edge_index: jax.Array, num_nodes: int) -> jax.Array:
    src, dst = edge_index[0], edge_index[1]
    a = jnp.zeros((num_nodes, num_nodes), jnp.float32)
    a = a.at[src, dst].add(1.0)                       # A
    a = a + jnp.eye(num_nodes, dtype=jnp.float32)     # A + I (self loops)
    deg = jnp.sum(a, axis=1)
    d_inv_sqrt = jnp.where(deg > 0, 1.0 / jnp.sqrt(deg), 0.0)
    return a * d_inv_sqrt[:, None] * d_inv_sqrt[None, :]


def attribute_decoder_forward(x, edge_index, params):
    n = x.shape[0]
    a_hat = normalized_adjacency(edge_index, n)
    return attribute_decoder_apply(a_hat, x, params)


def init_params(key, nfeat: int, nhid: int):
    k1, k2, k3, k4 = jax.random.split(key, 4)
    lim1 = (6.0 / (nhid + nhid)) ** 0.5
    lim2 = (6.0 / (nhid + nfeat)) ** 0.5
    return {
        "w1": jax.random.uniform(k1, (nhid, nhid), jnp.float32, -lim1, lim1),
        "b1": 0.1 * jax.random.normal(k3, (nhid,), jnp.float32),
        "w2": jax.random.uniform(k2, (nhid, nfeat), jnp.float32, -lim2, lim2),
        "b2": 0.1 * jax.random.normal(k4, (nfeat,), jnp.float32),
    }


# Pure-JAX reference matching the kernel's bf16-input / f32-accumulate math.
def reference_forward_bf16(a_hat, x, params):
    bf16, f32 = jnp.bfloat16, jnp.float32
    a = a_hat.astype(bf16)
    xw1 = jnp.dot(x.astype(bf16), params["w1"].astype(bf16),
                  preferred_element_type=f32).astype(bf16)
    h = jnp.maximum(jnp.dot(a, xw1, preferred_element_type=f32)
                    + params["b1"], 0.0).astype(bf16)
    hw2 = jnp.dot(h, params["w2"].astype(bf16),
                  preferred_element_type=f32).astype(bf16)
    out = jnp.maximum(jnp.dot(a, hw2, preferred_element_type=f32)
                      + params["b2"], 0.0)
    return out


if __name__ == "__main__":
    key = jax.random.PRNGKey(0)
    k_x, k_e, k_p = jax.random.split(key, 3)

    N = 256      # number of nodes
    NHID = 32    # hidden dim (input to decoder)
    NFEAT = 48   # reconstructed attribute dim
    E = 1024     # number of edges

    x = jax.random.normal(k_x, (N, NHID), jnp.float32)
    edge_index = jax.random.randint(k_e, (2, E), 0, N, jnp.int32)
    params = init_params(k_p, NFEAT, NHID)

    out = attribute_decoder_forward(x, edge_index, params)
    out = jax.block_until_ready(out)
    assert out.shape == (N, NFEAT)

    a_hat = normalized_adjacency(edge_index, N)

    # Tight check vs. a reference using the same bf16-input / f32-accum math.
    ref_bf16 = reference_forward_bf16(a_hat, x, params)
    assert jnp.allclose(out, ref_bf16, atol=1e-2, rtol=1e-2), float(
        jnp.max(jnp.abs(out - ref_bf16)))

    # Looser sanity check vs. the full-f32 module semantics.
    ref_f32 = jnp.maximum(a_hat @ (x @ params["w1"]) + params["b1"], 0.0)
    ref_f32 = jnp.maximum(a_hat @ (ref_f32 @ params["w2"]) + params["b2"], 0.0)
    assert jnp.allclose(out, ref_f32, atol=1e-1, rtol=1e-1), float(
        jnp.max(jnp.abs(out - ref_f32)))

    print("KERNEL_OK")
</pallas_src>

<mosaic_0001>
module attributes {stable_mosaic.version = 11 : i64} {
  func.func @_fused_attr_decoder_kernel(%arg0: i32, %arg1: i32, %arg2: memref<256x256xbf16, #tpu.memory_space<vmem>>, %arg3: memref<256x128xbf16, #tpu.memory_space<vmem>>, %arg4: memref<128x128xbf16, #tpu.memory_space<vmem>>, %arg5: memref<1x128xf32, #tpu.memory_space<vmem>>, %arg6: memref<128x128xbf16, #tpu.memory_space<vmem>>, %arg7: memref<1x128xf32, #tpu.memory_space<vmem>>, %arg8: memref<256x128xf32, #tpu.memory_space<vmem>>, %arg9: memref<256x128xbf16, #tpu.memory_space<vmem>>, %arg10: memref<256x128xbf16, #tpu.memory_space<vmem>>, %arg11: memref<256x128xbf16, #tpu.memory_space<vmem>>) attributes {dimension_semantics = [#tpu.dimension_semantics<arbitrary>, #tpu.dimension_semantics<arbitrary>], iteration_bounds = array<i64: 2, 1>, scalar_prefetch = 0 : i64, scratch_operands = 3 : i64, tpu.core_type = #tpu.core_type<tc>, window_params = [{transform_indices = @transform_0, window_bounds = array<i64: 256, 256>}, {pipeline_mode = #tpu.pipeline_mode<synchronous>, transform_indices = @transform_1, window_bounds = array<i64: 256, 128>}, {pipeline_mode = #tpu.pipeline_mode<synchronous>, transform_indices = @transform_2, window_bounds = array<i64: 128, 128>}, {pipeline_mode = #tpu.pipeline_mode<synchronous>, transform_indices = @transform_3, window_bounds = array<i64: 1, 128>}, {pipeline_mode = #tpu.pipeline_mode<synchronous>, transform_indices = @transform_4, window_bounds = array<i64: 128, 128>}, {pipeline_mode = #tpu.pipeline_mode<synchronous>, transform_indices = @transform_5, window_bounds = array<i64: 1, 128>}, {transform_indices = @transform_6, window_bounds = array<i64: 256, 128>}]} {
    %c256_i32 = arith.constant 256 : i32
    %0 = arith.muli %arg1, %c256_i32 : i32
    %1 = tpu.assume_multiple %0, 256 : i32
    %c0_i32 = arith.constant 0 : i32
    %2 = arith.cmpi eq, %arg0, %c0_i32 : i32
    %c0_i32_0 = arith.constant 0 : i32
    %3 = arith.cmpi eq, %arg1, %c0_i32_0 : i32
    %4 = arith.andi %2, %3 : i1
    %5 = arith.extui %4 : i1 to i32
    %c0_i32_1 = arith.constant 0 : i32
    %6 = arith.cmpi ne, %5, %c0_i32_1 : i32
    scf.if %6 {
      %c0 = arith.constant 0 : index
      %c0_8 = arith.constant 0 : index
      %18 = vector.load %arg3[%c0, %c0_8] : memref<256x128xbf16, #tpu.memory_space<vmem>>, vector<256x128xbf16>
      %c0_9 = arith.constant 0 : index
      %c0_10 = arith.constant 0 : index
      %19 = vector.load %arg4[%c0_9, %c0_10] : memref<128x128xbf16, #tpu.memory_space<vmem>>, vector<128x128xbf16>
      %cst = arith.constant dense<0.000000e+00> : vector<256x128xf32>
      %20 = tpu.matmul %18, %19, %cst {dimension_numbers = #tpu.dot_dimension_numbers<[1], [0], [0], [1], [0, 0, 1, 1], [], []>} : vector<256x128xbf16>, vector<128x128xbf16>, vector<256x128xf32> -> vector<256x128xf32>
      %21 = arith.truncf %20 : vector<256x128xf32> to vector<256x128xbf16>
      %c0_11 = arith.constant 0 : index
      %c0_12 = arith.constant 0 : index
      %22 = vector.load %arg9[%c0_11, %c0_12] : memref<256x128xbf16, #tpu.memory_space<vmem>>, vector<256x128xbf16>
      tpu.vector_store %arg9[%c0_11, %c0_12], %21 {strides = array<i32>} : memref<256x128xbf16, #tpu.memory_space<vmem>>, vector<256x128xbf16>,
    } else {
    }
    %c0_i32_2 = arith.constant 0 : i32
    %7 = arith.cmpi eq, %arg0, %c0_i32_2 : i32
    %8 = arith.extui %7 : i1 to i32
    %c0_i32_3 = arith.constant 0 : i32
    %9 = arith.cmpi ne, %8, %c0_i32_3 : i32
    scf.if %9 {
      %c0 = arith.constant 0 : index
      %c0_8 = arith.constant 0 : index
      %18 = vector.load %arg2[%c0, %c0_8] : memref<256x256xbf16, #tpu.memory_space<vmem>>, vector<256x256xbf16>
      %c0_9 = arith.constant 0 : index
      %c0_10 = arith.constant 0 : index
      %19 = vector.load %arg9[%c0_9, %c0_10] : memref<256x128xbf16, #tpu.memory_space<vmem>>, vector<256x128xbf16>
      %cst = arith.constant dense<0.000000e+00> : vector<256x128xf32>
      %20 = tpu.matmul %18, %19, %cst {dimension_numbers = #tpu.dot_dimension_numbers<[1], [0], [0], [1], [0, 0, 1, 1], [], []>} : vector<256x256xbf16>, vector<256x128xbf16>, vector<256x128xf32> -> vector<256x128xf32>
      %c0_11 = arith.constant 0 : index
      %c0_12 = arith.constant 0 : index
      %21 = vector.load %arg5[%c0_11, %c0_12] : memref<1x128xf32, #tpu.memory_space<vmem>>, vector<1x128xf32>
      %22 = vector.broadcast %21 : vector<1x128xf32> to vector<256x128xf32>
      %23 = arith.addf %20, %22 : vector<256x128xf32>
      %cst_13 = arith.constant 0.000000e+00 : f32
      %24 = vector.broadcast %cst_13 : f32 to vector<256x128xf32>
      %25 = arith.maximumf %23, %24 : vector<256x128xf32>
      %26 = arith.truncf %25 : vector<256x128xf32> to vector<256x128xbf16>
      %27 = arith.index_cast %1 : i32 to index
      %c0_14 = arith.constant 0 : index
      %28 = vector.load %arg10[%27, %c0_14] : memref<256x128xbf16, #tpu.memory_space<vmem>>, vector<256x128xbf16>
      tpu.vector_store %arg10[%27, %c0_14], %26 {strides = array<i32>} : memref<256x128xbf16, #tpu.memory_space<vmem>>, vector<256x128xbf16>,
      %cst_15 = arith.constant 0.000000e+00 : f32
      %29 = vector.broadcast %cst_15 : f32 to vector<256x128xf32>
      %c0_16 = arith.constant 0 : index
      %c0_17 = arith.constant 0 : index
      %30 = vector.load %arg8[%c0_16, %c0_17] : memref<256x128xf32, #tpu.memory_space<vmem>>, vector<256x128xf32>
      tpu.vector_store %arg8[%c0_16, %c0_17], %29 {strides = array<i32>} : memref<256x128xf32, #tpu.memory_space<vmem>>, vector<256x128xf32>,
    } else {
    }
    %c1_i32 = arith.constant 1 : i32
    %10 = arith.cmpi eq, %arg0, %c1_i32 : i32
    %c0_i32_4 = arith.constant 0 : i32
    %11 = arith.cmpi eq, %arg1, %c0_i32_4 : i32
    %12 = arith.andi %10, %11 : i1
    %13 = arith.extui %12 : i1 to i32
    %c0_i32_5 = arith.constant 0 : i32
    %14 = arith.cmpi ne, %13, %c0_i32_5 : i32
    scf.if %14 {
      %c0 = arith.constant 0 : index
      %c0_8 = arith.constant 0 : index
      %18 = vector.load %arg10[%c0, %c0_8] : memref<256x128xbf16, #tpu.memory_space<vmem>>, vector<256x128xbf16>
      %c0_9 = arith.constant 0 : index
      %c0_10 = arith.constant 0 : index
      %19 = vector.load %arg6[%c0_9, %c0_10] : memref<128x128xbf16, #tpu.memory_space<vmem>>, vector<128x128xbf16>
      %cst = arith.constant dense<0.000000e+00> : vector<256x128xf32>
      %20 = tpu.matmul %18, %19, %cst {dimension_numbers = #tpu.dot_dimension_numbers<[1], [0], [0], [1], [0, 0, 1, 1], [], []>} : vector<256x128xbf16>, vector<128x128xbf16>, vector<256x128xf32> -> vector<256x128xf32>
      %21 = arith.truncf %20 : vector<256x128xf32> to vector<256x128xbf16>
      %c0_11 = arith.constant 0 : index
      %c0_12 = arith.constant 0 : index
      %22 = vector.load %arg11[%c0_11, %c0_12] : memref<256x128xbf16, #tpu.memory_space<vmem>>, vector<256x128xbf16>
      tpu.vector_store %arg11[%c0_11, %c0_12], %21 {strides = array<i32>} : memref<256x128xbf16, #tpu.memory_space<vmem>>, vector<256x128xbf16>,
    } else {
    }
    %c1_i32_6 = arith.constant 1 : i32
    %15 = arith.cmpi eq, %arg0, %c1_i32_6 : i32
    %16 = arith.extui %15 : i1 to i32
    %c0_i32_7 = arith.constant 0 : i32
    %17 = arith.cmpi ne, %16, %c0_i32_7 : i32
    scf.if %17 {
      %c0 = arith.constant 0 : index
      %c0_8 = arith.constant 0 : index
      %18 = vector.load %arg2[%c0, %c0_8] : memref<256x256xbf16, #tpu.memory_space<vmem>>, vector<256x256xbf16>
      %c0_9 = arith.constant 0 : index
      %c0_10 = arith.constant 0 : index
      %19 = vector.load %arg11[%c0_9, %c0_10] : memref<256x128xbf16, #tpu.memory_space<vmem>>, vector<256x128xbf16>
      %cst = arith.constant dense<0.000000e+00> : vector<256x128xf32>
      %20 = tpu.matmul %18, %19, %cst {dimension_numbers = #tpu.dot_dimension_numbers<[1], [0], [0], [1], [0, 0, 1, 1], [], []>} : vector<256x256xbf16>, vector<256x128xbf16>, vector<256x128xf32> -> vector<256x128xf32>
      %c0_11 = arith.constant 0 : index
      %c0_12 = arith.constant 0 : index
      %21 = vector.load %arg7[%c0_11, %c0_12] : memref<1x128xf32, #tpu.memory_space<vmem>>, vector<1x128xf32>
      %22 = vector.broadcast %21 : vector<1x128xf32> to vector<256x128xf32>
      %23 = arith.addf %20, %22 : vector<256x128xf32>
      %cst_13 = arith.constant 0.000000e+00 : f32
      %24 = vector.broadcast %cst_13 : f32 to vector<256x128xf32>
      %25 = arith.maximumf %23, %24 : vector<256x128xf32>
      %c0_14 = arith.constant 0 : index
      %c0_15 = arith.constant 0 : index
      %26 = vector.load %arg8[%c0_14, %c0_15] : memref<256x128xf32, #tpu.memory_space<vmem>>, vector<256x128xf32>
      tpu.vector_store %arg8[%c0_14, %c0_15], %25 {strides = array<i32>} : memref<256x128xf32, #tpu.memory_space<vmem>>, vector<256x128xf32>,
    } else {
    }
    return
  }
  func.func @transform_0(%arg0: i32, %arg1: i32) -> (i32, i32) {
    %c0_i32 = arith.constant 0 : i32
    %c0_i32_0 = arith.constant 0 : i32
    return %arg1, %c0_i32 : i32, i32
  }
  func.func @transform_1(%arg0: i32, %arg1: i32) -> (i32, i32) {
    %c0_i32 = arith.constant 0 : i32
    %c0_i32_0 = arith.constant 0 : i32
    %c0_i32_1 = arith.constant 0 : i32
    return %c0_i32, %c0_i32_0 : i32, i32
  }
  func.func @transform_2(%arg0: i32, %arg1: i32) -> (i32, i32) {
    %c0_i32 = arith.constant 0 : i32
    %c0_i32_0 = arith.constant 0 : i32
    %c0_i32_1 = arith.constant 0 : i32
    return %c0_i32, %c0_i32_0 : i32, i32
  }
  func.func @transform_3(%arg0: i32, %arg1: i32) -> (i32, i32) {
    %c0_i32 = arith.constant 0 : i32
    %c0_i32_0 = arith.constant 0 : i32
    %c0_i32_1 = arith.constant 0 : i32
    return %c0_i32, %c0_i32_0 : i32, i32
  }
  func.func @transform_4(%arg0: i32, %arg1: i32) -> (i32, i32) {
    %c0_i32 = arith.constant 0 : i32
    %c0_i32_0 = arith.constant 0 : i32
    %c0_i32_1 = arith.constant 0 : i32
    return %c0_i32, %c0_i32_0 : i32, i32
  }
  func.func @transform_5(%arg0: i32, %arg1: i32) -> (i32, i32) {
    %c0_i32 = arith.constant 0 : i32
    %c0_i32_0 = arith.constant 0 : i32
    %c0_i32_1 = arith.constant 0 : i32
    return %c0_i32, %c0_i32_0 : i32, i32
  }
  func.func @transform_6(%arg0: i32, %arg1: i32) -> (i32, i32) {
    %c0_i32 = arith.constant 0 : i32
    %c0_i32_0 = arith.constant 0 : i32
    return %arg1, %c0_i32 : i32, i32
  }
}

</mosaic_0001>

<bundles_post_ra>
// kernel: tpu_custom_call.1
= control target key start
LH: loop header
LB: loop body
LE: loop exit
PB: predicated region body
PF: predicated region fallthrough
CT: control target
= control target key end

     0   :  { %11 = vsyncpa [#allocation6], 0  ;;  %s4465_s0 = inlined_call_operand.hbm [shape: bf16[256,256], index: 0, kind: input, shape index: {}]   ;;  %s4466_s1 = inlined_call_operand.hbm [shape: bf16[256,128], index: 1, kind: input, shape index: {}]   ;;  %s4467_s2 = inlined_call_operand.hbm [shape: bf16[128,128], index: 2, kind: input, shape index: {}]   ;;  %s4468_s3 = inlined_call_operand.vmem [shape: f32[1,128], index: 3, kind: input, shape index: {}]   ;;  %s4469_s4 = inlined_call_operand.hbm [shape: bf16[128,128], index: 4, kind: input, shape index: {}]   ;;  %s4470_s5 = inlined_call_operand.vmem [shape: f32[1,128], index: 5, kind: input, shape index: {}]   ;;  %s4471_s6 = inlined_call_operand.hbm [shape: f32[256,128], index: 6, kind: output, shape index: {}]  }
   0x1   :  { %12 = vsyncpa [#allocation9], 0 }
   0x2   :  { %13 = vsyncpa [#allocation12], 0 }
   0x3   :  { %14 = vsyncpa [#allocation7], 0  ;;  %s4259_s21 = smov 0   ;;  %s4261_s22 = smov 0  }
   0x4   :  { %s4263_s23 = smov 0  }
   0x5 LB: > { %s4212_s24 = smov [#allocation8]   ;;  %s2713_s26 = sadd.s32 4294967295, %s4210_s23   ;;  %s4210_s23 = sphi %s4263_s23, %s20_s23   ;;  %s4206_s22 = sphi %s4261_s22, %s4478_s22   ;;  %s4202_s21 = sphi %s4259_s21, %s4477_s21  }
   0x6   : > { %s223_s25 = sshll.u32 %s4212_s24, 4  ;;  %p2714_p0 = scmp.ge.s32.totalorder %s4210_s23, 1  ;;  %s224_s25 = int_to_ptr.vmem [resolvable:$true] %s223_s25 }
   0x7   : > { %p194_p1 = scmp.lt.s32.totalorder %s4210_s23, 3  ;;  %p4279_p2 = scmp.eq.s32.totalorder %s2713_s26, 0 }
   0x8   : > { %s32_s30 = sadd.s32 1, %s4206_s22  ;;  %s4213_s8 = smov [#allocation5]  }
   0x9   : > { %p4283_p3 = pnand %p2714_p0, %p194_p1  ;;  %p4296_p6 = scmp.ge.s32.totalorder %s32_s30, 2 }
   0xa   : > { %s210_s9 = sshll.u32 %s4213_s8, 4  ;;  %s4055_s10 = scalar_lea.vmem %s224_s25, 2048  ;;  %s211_s9 = int_to_ptr.vmem [resolvable:$true] %s210_s9 }
   0xb   : > { %p3809_p4 = pneg %p4283_p3  ;;  %p4056_p8 = scmp.ne.s32.totalorder %s224_s25, %s4055_s10 }
   0xc   : > { %p4063_p11 = scmp.lt.s32.totalorder %s224_s25, %s224_s25  ;;  %p4064_p12 = scmp.lt.s32.totalorder %s4055_s10, %s4055_s10 }
   0xd   : > { %p4291_p5 = pnand %p4279_p2, %p3809_p4 }
   0xe   : > { %p4065_p13 = por %p4064_p12, %p4063_p11 }
   0xf   : > { %p4046_p7 = pneg %p4291_p5 }
  0x11   : > { %p4058_p9 = pnand %p4056_p8, %p4046_p7 }
  0x13   : > { %p4059_p10 = pneg %p4058_p9 }
  0x15   : > { %p4066_p0 = pnand %p4065_p13, %p4059_p10 }
  0x17   : > { %4069 = shalt.err (!%p4066_p0)
}
  0x18   : > { %s4214_s11 = smov 64   ;;  %s4215_s12 = smov 4  }
  0x19   : > { %3815 = dma.hbm_to_vmem [thread:$0]  (!%p4291_p5), %s4466_s1, 2048, %s224_s25, [#allocation9], %s4214_s11, %s4214_s11, %s4215_s12  }
  0x1a   : > { %s4480_s30 = smov (%p4296_p6, %s32_s30), 0  ;;  %s4081_s15 = scalar_lea.vmem %s211_s9, 4096 }
  0x1b   : > { %p4082_p1 = scmp.ne.s32.totalorder %s211_s9, %s4081_s15  ;;  %p4089_p9 = scmp.lt.s32.totalorder %s211_s9, %s211_s9 }
  0x1c   : > { %p4090_p10 = scmp.lt.s32.totalorder %s4081_s15, %s4081_s15 }
  0x1d   : > { %p4084_p4 = pnand %p4082_p1, %p4046_p7 }
  0x1e   : > { %p4091_p11 = por %p4090_p10, %p4089_p9 }
  0x1f   : > { %p4085_p8 = pneg %p4084_p4 }
  0x21   : > { %p4092_p12 = pnand %p4091_p11, %p4085_p8 }
  0x23   : > { %4095 = shalt.err (!%p4092_p12)
}
  0x24   : > { %s4216_s16 = smov 128   ;;  %s4217_s17 = smov 8  }
  0x25   : > { %3812 = dma.hbm_to_vmem [thread:$0]  (!%p4291_p5), %s4465_s0, 4096, %s211_s9, [#allocation6], %s4216_s16, %s4216_s16, %s4217_s17  }
  0x26   : > { %s4218_s20 = smov [#allocation10]   ;;  %s4219_s25 = smov [#allocation11]  }
  0x27   : > { %s236_s24 = sshll.u32 %s4218_s20, 4  ;;  %s252_s7 = sshll.u32 %s4219_s25, 4  ;;  %s237_s24 = int_to_ptr.vmem [resolvable:$true] %s236_s24  ;;  %s253_s7 = int_to_ptr.vmem [resolvable:$true] %s252_s7 }
  0x28   : > { %s4107_s8 = scalar_lea.vmem %s237_s24, 1024  ;;  %p4115_p1 = scmp.lt.s32.totalorder %s237_s24, %s237_s24 }
  0x29   : > { %p4108_p6 = scmp.ne.s32.totalorder %s237_s24, %s4107_s8  ;;  %p4116_p4 = scmp.lt.s32.totalorder %s4107_s8, %s4107_s8 }
  0x2b   : > { %p4110_p13 = pnand %p4108_p6, %p4046_p7  ;;  %p4117_p8 = por %p4116_p4, %p4115_p1 }
  0x2d   : > { %p4111_p0 = pneg %p4110_p13 }
  0x2f   : > { %p4118_p9 = pnand %p4117_p8, %p4111_p0 }
  0x31   : > { %4121 = shalt.err (!%p4118_p9)
}
  0x32   : > { %3818 = dma.hbm_to_vmem [thread:$0]  (!%p4291_p5), %s4467_s2, 1024, %s237_s24, [#allocation9], %s4214_s11, %s4214_s11, %s4215_s12  }
  0x33   : > { %s4133_s13 = scalar_lea.vmem %s253_s7, 1024  ;;  %p4141_p6 = scmp.lt.s32.totalorder %s253_s7, %s253_s7 }
  0x34   : > { %p4134_p10 = scmp.ne.s32.totalorder %s253_s7, %s4133_s13  ;;  %p4142_p13 = scmp.lt.s32.totalorder %s4133_s13, %s4133_s13 }
  0x36   : > { %p4136_p11 = pnand %p4134_p10, %p4046_p7  ;;  %p4143_p0 = por %p4142_p13, %p4141_p6 }
  0x38   : > { %p4137_p12 = pneg %p4136_p11 }
  0x3a   : > { %p4144_p1 = pnand %p4143_p0, %p4137_p12 }
  0x3c   : > { %4147 = shalt.err (!%p4144_p1)
}
  0x3d   : > { %3821 = dma.hbm_to_vmem [thread:$0]  (!%p4291_p5), %s4469_s4, 1024, %s253_s7, [#allocation12], %s4214_s11, %s4214_s11, %s4215_s12  }
  0x3e   : > { %271 = sbr.rel (%p4283_p3) target bundleno = 1214 (0x4be), region = 44 }
  0x43   : > { %4185 = dma.done.wait (%p4279_p2), [#allocation6], 4096  }
  0x44   : > { %4187 = vsyncadd (%p4279_p2), [#allocation6], 4294963200 }
  0x45   : > { %4189 = dma.done.wait (%p4279_p2), [#allocation9], 3072  }
  0x46   : > { %4191 = vsyncadd (%p4279_p2), [#allocation9], 4294964224 }
  0x47   : > { %4193 = dma.done.wait (%p4279_p2), [#allocation12], 1024  }
  0x48   : > { %4195 = vsyncadd (%p4279_p2), [#allocation12], 4294966272  ;;  %p307_p3 = scmp.eq.s32.totalorder %s4202_s21, 0 }
  0x49   : > { %v3868_v0 = vld [vmem:[#allocation10 + $0x38] sm:$0xff] (%p307_p3)   ;;  %v3869_v1 = vld [vmem:[#allocation10 + $0x30] sm:$0xff] (%p307_p3)   ;;  %v3870_v2 = vld [vmem:[#allocation10 + $0x28] sm:$0xff] (%p307_p3)  }
  0x4a   : > { %312 = sbr.rel (!%p307_p3) target bundleno = 332 (0x14c), region = 64  ;;  %3629 = vmatprep.subr.bf16.mxu0 (%p307_p3), %v3868_v0  ;;  %3725 = vmatprep.subr.bf16.mxu1 (%p307_p3), %v3868_v0  ;;  %v3871_v3 = vld [vmem:[#allocation10 + $0x20] sm:$0xff] (%p307_p3)   ;;  %v3872_v6 = vld [vmem:[#allocation10 + $0x18] sm:$0xff] (%p307_p3)   ;;  %v3873_v7 = vld [vmem:[#allocation10 + $0x10] sm:$0xff] (%p307_p3)  }
  0x4b   : > { %3630 = vmatpush3.bf16.msra.mxu0 (%p307_p3), %v3868_v0  ;;  %3733 = vmatpush3.bf16.msra.mxu1 (%p307_p3), %v3868_v0  ;;  %v3876_v4 = vld [vmem:[#allocation8] sm:$0xff] (%p307_p3)   ;;  %v3874_v8 = vld [vmem:[#allocation10 + $0x8] sm:$0xff] (%p307_p3)   ;;  %v3880_v12 = vld [vmem:[#allocation8 + $0x10] sm:$0xff] (%p307_p3)  }
  0x4c   : > { %3631 = vmatprep.subr.bf16.mxu0 (%p307_p3), %v3869_v1  ;;  %3726 = vmatprep.subr.bf16.mxu1 (%p307_p3), %v3869_v1  ;;  %v3877_v5 = vld [vmem:[#allocation8 + $0x40] sm:$0xff] (%p307_p3)   ;;  %v3878_v10 = vld [vmem:[#allocation8 + $0x8] sm:$0xff] (%p307_p3)   ;;  %v3881_v13 = vld [vmem:[#allocation8 + $0x50] sm:$0xff] (%p307_p3)  }
  0x4d   : > { %3645 = vmatprep.mubr.bf16.mxu0 (%p307_p3), %v3876_v4  ;;  %3661 = vmatprep.mubr.bf16.mxu1 (%p307_p3), %v3877_v5  ;;  %v3875_v9 = vld [vmem:[#allocation10] sm:$0xff] (%p307_p3)   ;;  %v3879_v11 = vld [vmem:[#allocation8 + $0x48] sm:$0xff] (%p307_p3)   ;;  %v3882_v14 = vld [vmem:[#allocation8 + $0x18] sm:$0xff] (%p307_p3)  }
  0x4e   : > { %v3883_v15 = vld [vmem:[#allocation8 + $0x58] sm:$0xff] (%p307_p3)   ;;  %v3884_v16 = vld [vmem:[#allocation8 + $0x20] sm:$0xff] (%p307_p3)   ;;  %v3886_v18 = vld [vmem:[#allocation8 + $0x28] sm:$0xff] (%p307_p3)  }
  0x4f   : > { %3632 = vmatpush3.bf16.msra.mxu0 %v3869_v1  ;;  %3734 = vmatpush3.bf16.msra.mxu1 %v3869_v1  ;;  %v3885_v17 = vld [vmem:[#allocation8 + $0x60] sm:$0xff]   ;;  %v3887_v19 = vld [vmem:[#allocation8 + $0x68] sm:$0xff]   ;;  %v3888_v20 = vld [vmem:[#allocation8 + $0x30] sm:$0xff]  }
  0x50   : > { %3633 = vmatprep.subr.bf16.mxu0 %v3870_v2  ;;  %3727 = vmatprep.subr.bf16.mxu1 %v3870_v2  ;;  %v3889_v21 = vld [vmem:[#allocation8 + $0x70] sm:$0xff]   ;;  %v3890_v22 = vld [vmem:[#allocation8 + $0x38] sm:$0xff]  }
  0x51   : > { %v3891_v23 = vld [vmem:[#allocation8 + $0x78] sm:$0xff]  }
  0x53   : > { %3634 = vmatpush3.bf16.msra.mxu0 %v3870_v2  ;;  %3735 = vmatpush3.bf16.msra.mxu1 %v3870_v2 }
  0x54   : > { %3635 = vmatprep.subr.bf16.mxu0 %v3871_v3  ;;  %3728 = vmatprep.subr.bf16.mxu1 %v3871_v3 }
  0x57   : > { %3636 = vmatpush3.bf16.msra.mxu0 %v3871_v3  ;;  %3736 = vmatpush3.bf16.msra.mxu1 %v3871_v3 }
  0x58   : > { %3637 = vmatprep.subr.bf16.mxu0 %v3872_v6  ;;  %3729 = vmatprep.subr.bf16.mxu1 %v3872_v6 }
  0x5b   : > { %3638 = vmatpush3.bf16.msra.mxu0 %v3872_v6  ;;  %3737 = vmatpush3.bf16.msra.mxu1 %v3872_v6 }
  0x5c   : > { %3639 = vmatprep.subr.bf16.mxu0 %v3873_v7  ;;  %3730 = vmatprep.subr.bf16.mxu1 %v3873_v7 }
  0x5f   : > { %3640 = vmatpush3.bf16.msra.mxu0 %v3873_v7  ;;  %3738 = vmatpush3.bf16.msra.mxu1 %v3873_v7 }
  0x60   : > { %3641 = vmatprep.subr.bf16.mxu0 %v3874_v8  ;;  %3731 = vmatprep.subr.bf16.mxu1 %v3874_v8 }
  0x63   : > { %3642 = vmatpush3.bf16.msra.mxu0 %v3874_v8  ;;  %3739 = vmatpush3.bf16.msra.mxu1 %v3874_v8 }
  0x64   : > { %3643 = vmatprep.subr.bf16.mxu0 %v3875_v9  ;;  %3732 = vmatprep.subr.bf16.mxu1 %v3875_v9 }
  0x67   : > { %3644 = vmatpush3.bf16.msra.mxu0 %v3875_v9  ;;  %3740 = vmatpush3.bf16.msra.mxu1 %v3875_v9 }
  0x6a   : > { %3646 = vmatmul.mubr.bf16.vlgmr.msra.gmra.mxu0 %v3878_v10  ;;  %3662 = vmatmul.mubr.bf16.vlgmr.msra.gmra.mxu1 %v3879_v11 }
  0x6b   : > { %3649 = vmatprep.mubr.bf16.mxu0 %v3880_v12  ;;  %3665 = vmatprep.mubr.bf16.mxu1 %v3881_v13 }
  0x72   : > { %3650 = vmatmul.mubr.bf16.gmra.mxu0 %v3882_v14  ;;  %3666 = vmatmul.mubr.bf16.gmra.mxu1 %v3883_v15 }
  0x73   : > { %3653 = vmatprep.mubr.bf16.mxu0 %v3884_v16  ;;  %3669 = vmatprep.mubr.bf16.mxu1 %v3885_v17 }
  0x7a   : > { %3654 = vmatmul.mubr.bf16.gmra.mxu0 %v3886_v18  ;;  %3670 = vmatmul.mubr.bf16.gmra.mxu1 %v3887_v19 }
  0x7b   : > { %3657 = vmatprep.mubr.bf16.mxu0 %v3888_v20  ;;  %3673 = vmatprep.mubr.bf16.mxu1 %v3889_v21 }
  0x82   : > { %3658 = vmatmul.mubr.bf16.gmra.mxu0 %v3890_v22  ;;  %3674 = vmatmul.mubr.bf16.gmra.mxu1 %v3891_v23 }
 0x12a   : > { %v3647_v24 = vpop.f32.mrf.mxu0  ;;  %v3663_v25 = vpop.f32.mrf.mxu1 }
 0x12c   : > { %v539_v26 = vpop.f32.mrf.mxu0  ;;  %v603_v27 = vpop.f32.mrf.mxu1 }
 0x12e   : > { %v3648_v28 = vpop.f32.mrf.mxu0  ;;  %v3664_v29 = vpop.f32.mrf.mxu1 }
 0x12f   : > { %v3080_v30 = vpack.c.bf16 %v3648_v28, %v3647_v24  ;;  %v3120_v31 = vpack.c.bf16 %v3664_v29, %v3663_v25 }
 0x130   : > { %v542_v32 = vpop.f32.mrf.mxu0  ;;  %v606_v33 = vpop.f32.mrf.mxu1 }
 0x131   : > { %3312 = vst [vmem:[#allocation2 + $0x8] sm:$0xff] %v3080_v30   ;;  %3320 = vst [vmem:[#allocation2 + $0x48] sm:$0xff] %v3120_v31   ;;  %v3075_v34 = vpack.c.bf16 %v542_v32, %v539_v26  ;;  %v3115_v35 = vpack.c.bf16 %v606_v33, %v603_v27 }
 0x132   : > { %v3651_v36 = vpop.f32.mrf.mxu0  ;;  %v3667_v37 = vpop.f32.mrf.mxu1 }
 0x133   : > { %3076 = vst [vmem:[#allocation2] sm:$0xff] %v3075_v34   ;;  %3319 = vst [vmem:[#allocation2 + $0x40] sm:$0xff] %v3115_v35  }
 0x134   : > { %v555_v38 = vpop.f32.mrf.mxu0  ;;  %v619_v39 = vpop.f32.mrf.mxu1 }
 0x136   : > { %v3652_v40 = vpop.f32.mrf.mxu0  ;;  %v3668_v41 = vpop.f32.mrf.mxu1 }
 0x137   : > { %v3090_v42 = vpack.c.bf16 %v3652_v40, %v3651_v36  ;;  %v3130_v43 = vpack.c.bf16 %v3668_v41, %v3667_v37 }
 0x138   : > { %v558_v44 = vpop.f32.mrf.mxu0  ;;  %v622_v45 = vpop.f32.mrf.mxu1 }
 0x139   : > { %3314 = vst [vmem:[#allocation2 + $0x18] sm:$0xff] %v3090_v42   ;;  %3322 = vst [vmem:[#allocation2 + $0x58] sm:$0xff] %v3130_v43   ;;  %v3085_v46 = vpack.c.bf16 %v558_v44, %v555_v38  ;;  %v3125_v47 = vpack.c.bf16 %v622_v45, %v619_v39 }
 0x13a   : > { %v3655_v48 = vpop.f32.mrf.mxu0  ;;  %v3671_v49 = vpop.f32.mrf.mxu1 }
 0x13b   : > { %3313 = vst [vmem:[#allocation2 + $0x10] sm:$0xff] %v3085_v46   ;;  %3321 = vst [vmem:[#allocation2 + $0x50] sm:$0xff] %v3125_v47  }
 0x13c   : > { %v571_v50 = vpop.f32.mrf.mxu0  ;;  %v635_v51 = vpop.f32.mrf.mxu1 }
 0x13e   : > { %v3656_v52 = vpop.f32.mrf.mxu0  ;;  %v3672_v53 = vpop.f32.mrf.mxu1 }
 0x13f   : > { %v3100_v54 = vpack.c.bf16 %v3656_v52, %v3655_v48  ;;  %v3140_v55 = vpack.c.bf16 %v3672_v53, %v3671_v49 }
 0x140   : > { %v574_v56 = vpop.f32.mrf.mxu0  ;;  %v638_v57 = vpop.f32.mrf.mxu1 }
 0x141   : > { %3316 = vst [vmem:[#allocation2 + $0x28] sm:$0xff] %v3100_v54   ;;  %3324 = vst [vmem:[#allocation2 + $0x68] sm:$0xff] %v3140_v55   ;;  %v3095_v58 = vpack.c.bf16 %v574_v56, %v571_v50  ;;  %v3135_v59 = vpack.c.bf16 %v638_v57, %v635_v51 }
 0x142   : > { %v3659_v60 = vpop.f32.mrf.mxu0  ;;  %v3675_v61 = vpop.f32.mrf.mxu1 }
 0x143   : > { %3315 = vst [vmem:[#allocation2 + $0x20] sm:$0xff] %v3095_v58   ;;  %3323 = vst [vmem:[#allocation2 + $0x60] sm:$0xff] %v3135_v59  }
 0x144   : > { %v587_v62 = vpop.f32.mrf.mxu0  ;;  %v651_v63 = vpop.f32.mrf.mxu1 }
 0x146   : > { %v3660_v0 = vpop.f32.mrf.mxu0  ;;  %v3676_v1 = vpop.f32.mrf.mxu1 }
 0x147   : > { %v3110_v2 = vpack.c.bf16 %v3660_v0, %v3659_v60  ;;  %v3150_v3 = vpack.c.bf16 %v3676_v1, %v3675_v61 }
 0x148   : > { %v590_v4 = vpop.f32.mrf.mxu0  ;;  %v654_v5 = vpop.f32.mrf.mxu1 }
 0x149   : > { %3318 = vst [vmem:[#allocation2 + $0x38] sm:$0xff] %v3110_v2   ;;  %3326 = vst [vmem:[#allocation2 + $0x78] sm:$0xff] %v3150_v3   ;;  %v3105_v6 = vpack.c.bf16 %v590_v4, %v587_v62  ;;  %v3145_v7 = vpack.c.bf16 %v654_v5, %v651_v63 }
 0x14b   : > { %3317 = vst [vmem:[#allocation2 + $0x30] sm:$0xff] %v3105_v6   ;;  %3325 = vst [vmem:[#allocation2 + $0x70] sm:$0xff] %v3145_v7  }
 0x14c PF: > { %p2781_p2 = scmp.ne.s32.totalorder %s4202_s21, 0 }
 0x14e   : > { %828 = sbr.rel (%p2781_p2) target bundleno = 636 (0x27c), region = 68 }
 0x153   : > { %v3892_v8 = vld [vmem:[#allocation2 + $0x78] sm:$0xff]   ;;  %v3894_v10 = vld [vmem:[#allocation2 + $0x70] sm:$0xff]   ;;  %v3896_v12 = vld [vmem:[#allocation2 + $0x68] sm:$0xff]   ;;  %v4220_v56 = vmov 0.0  }
 0x154   : > { %v3893_v9 = vld [vmem:[#allocation2 + $0x38] sm:$0xff]   ;;  %3381 = vmatprep.subr.bf16.mxu0 %v3892_v8  ;;  %3741 = vmatprep.subr.bf16.mxu1 %v3892_v8  ;;  %v3895_v11 = vld [vmem:[#allocation2 + $0x30] sm:$0xff]   ;;  %v3897_v13 = vld [vmem:[#allocation2 + $0x28] sm:$0xff]   ;;  %1513 = vst [vmem:[#allocation13] sm:$0xff] %v4220_v56 }
 0x155   : > { %3382 = vmatpush3.bf16.msra.mxu0 %v3893_v9  ;;  %3749 = vmatpush3.bf16.msra.mxu1 %v3893_v9  ;;  %v3898_v14 = vld [vmem:[#allocation2 + $0x60] sm:$0xff]   ;;  %v3900_v16 = vld [vmem:[#allocation2 + $0x58] sm:$0xff]   ;;  %v3902_v18 = vld [vmem:[#allocation2 + $0x50] sm:$0xff]   ;;  %1514 = vst [vmem:[#allocation13 + $0x8] sm:$0xff] %v4220_v56 }
 0x156   : > { %3383 = vmatprep.subr.bf16.mxu0 %v3894_v10  ;;  %3742 = vmatprep.subr.bf16.mxu1 %v3894_v10  ;;  %v3899_v15 = vld [vmem:[#allocation2 + $0x20] sm:$0xff]   ;;  %v3901_v17 = vld [vmem:[#allocation2 + $0x18] sm:$0xff]   ;;  %v3903_v21 = vld [vmem:[#allocation2 + $0x10] sm:$0xff]   ;;  %1515 = vst [vmem:[#allocation13 + $0x10] sm:$0xff] %v4220_v56 }
 0x157   : > { %v3910_v19 = vld [vmem:[#allocation5 + $0x4] ss:$8 sps:$4 sm:$0xff]   ;;  %v3908_v26 = vld [vmem:[#allocation5] ss:$8 sps:$4 sm:$0xff]   ;;  %v3914_v28 = vld [vmem:[#allocation5 + $0x14] ss:$8 sps:$4 sm:$0xff]  }
 0x158   : > { %v3913_v20 = vld [vmem:[#allocation5 + $0x84] ss:$8 sps:$4 sm:$0xff]   ;;  %1188 = vmatprep.mubr.bf16.mxu0 %v3910_v19  ;;  %v3911_v27 = vld [vmem:[#allocation5 + $0x80] ss:$8 sps:$4 sm:$0xff]   ;;  %v3916_v29 = vld [vmem:[#allocation5 + $0x94] ss:$8 sps:$4 sm:$0xff]  }
 0x159   : > { %3384 = vmatpush3.bf16.msra.mxu0 %v3895_v11  ;;  %3750 = vmatpush3.bf16.msra.mxu1 %v3895_v11  ;;  %v3904_v22 = vld [vmem:[#allocation2 + $0x48] sm:$0xff]   ;;  %v3906_v24 = vld [vmem:[#allocation2 + $0x40] sm:$0xff]   ;;  %v3918_v30 = vld [vmem:[#allocation5 + $0x10] ss:$8 sps:$4 sm:$0xff]   ;;  %1516 = vst [vmem:[#allocation13 + $0x18] sm:$0xff] %v4220_v56 }
 0x15a   : > { %3385 = vmatprep.subr.bf16.mxu0 %v3896_v12  ;;  %3743 = vmatprep.subr.bf16.mxu1 %v3896_v12  ;;  %v3905_v23 = vld [vmem:[#allocation2 + $0x8] sm:$0xff]   ;;  %v3907_v25 = vld [vmem:[#allocation2] sm:$0xff]   ;;  %v3919_v31 = vld [vmem:[#allocation5 + $0x90] ss:$8 sps:$4 sm:$0xff]   ;;  %1517 = vst [vmem:[#allocation13 + $0x20] sm:$0xff] %v4220_v56 }
 0x15b   : > { %1252 = vmatprep.mubr.bf16.mxu1 %v3913_v20  ;;  %v3920_v32 = vld [vmem:[#allocation5 + $0x24] ss:$8 sps:$4 sm:$0xff]   ;;  %v3924_v34 = vld [vmem:[#allocation5 + $0x20] ss:$8 sps:$4 sm:$0xff]   ;;  %v3926_v36 = vld [vmem:[#allocation5 + $0x34] ss:$8 sps:$4 sm:$0xff]  }
 0x15c   : > { %v3922_v33 = vld [vmem:[#allocation5 + $0xa4] ss:$8 sps:$4 sm:$0xff]   ;;  %v3925_v35 = vld [vmem:[#allocation5 + $0xa0] ss:$8 sps:$4 sm:$0xff]   ;;  %v3928_v37 = vld [vmem:[#allocation5 + $0xb4] ss:$8 sps:$4 sm:$0xff]  }
 0x15d   : > { %3386 = vmatpush3.bf16.msra.mxu0 %v3897_v13  ;;  %3751 = vmatpush3.bf16.msra.mxu1 %v3897_v13  ;;  %v3930_v38 = vld [vmem:[#allocation5 + $0x30] ss:$8 sps:$4 sm:$0xff]   ;;  %v3932_v40 = vld [vmem:[#allocation5 + $0x44] ss:$8 sps:$4 sm:$0xff]   ;;  %v3936_v42 = vld [vmem:[#allocation5 + $0x40] ss:$8 sps:$4 sm:$0xff]  }
 0x15e   : > { %3387 = vmatprep.subr.bf16.mxu0 %v3898_v14  ;;  %3744 = vmatprep.subr.bf16.mxu1 %v3898_v14  ;;  %v3931_v39 = vld [vmem:[#allocation5 + $0xb0] ss:$8 sps:$4 sm:$0xff]   ;;  %v3934_v41 = vld [vmem:[#allocation5 + $0xc4] ss:$8 sps:$4 sm:$0xff]   ;;  %v3937_v43 = vld [vmem:[#allocation5 + $0xc0] ss:$8 sps:$4 sm:$0xff]  }
 0x15f   : > { %v3938_v44 = vld [vmem:[#allocation5 + $0x54] ss:$8 sps:$4 sm:$0xff]   ;;  %v3942_v46 = vld [vmem:[#allocation5 + $0x50] ss:$8 sps:$4 sm:$0xff]   ;;  %v3944_v48 = vld [vmem:[#allocation5 + $0x64] ss:$8 sps:$4 sm:$0xff]  }
 0x160   : > { %v3940_v45 = vld [vmem:[#allocation5 + $0xd4] ss:$8 sps:$4 sm:$0xff]   ;;  %v3943_v47 = vld [vmem:[#allocation5 + $0xd0] ss:$8 sps:$4 sm:$0xff]   ;;  %v3946_v49 = vld [vmem:[#allocation5 + $0xe4] ss:$8 sps:$4 sm:$0xff]  }
 0x161   : > { %3388 = vmatpush3.bf16.msra.mxu0 %v3899_v15  ;;  %3752 = vmatpush3.bf16.msra.mxu1 %v3899_v15  ;;  %v3948_v50 = vld [vmem:[#allocation5 + $0x60] ss:$8 sps:$4 sm:$0xff]   ;;  %v3950_v52 = vld [vmem:[#allocation5 + $0x74] ss:$8 sps:$4 sm:$0xff]   ;;  %v3954_v54 = vld [vmem:[#allocation5 + $0x70] ss:$8 sps:$4 sm:$0xff]  }
 0x162   : > { %3389 = vmatprep.subr.bf16.mxu0 %v3900_v16  ;;  %3745 = vmatprep.subr.bf16.mxu1 %v3900_v16  ;;  %v3949_v51 = vld [vmem:[#allocation5 + $0xe0] ss:$8 sps:$4 sm:$0xff]   ;;  %v3952_v53 = vld [vmem:[#allocation5 + $0xf4] ss:$8 sps:$4 sm:$0xff]   ;;  %v3955_v55 = vld [vmem:[#allocation5 + $0xf0] ss:$8 sps:$4 sm:$0xff]  }
 0x163   : > { %1518 = vst [vmem:[#allocation13 + $0x28] sm:$0xff] %v4220_v56  ;;  %1519 = vst [vmem:[#allocation13 + $0x30] sm:$0xff] %v4220_v56  ;;  %v4366_v61 = vld [vmem:[%s4468_s3] ss:$0 sm:$0xff] }
 0x164   : > { %1520 = vst [vmem:[#allocation13 + $0x38] sm:$0xff] %v4220_v56  ;;  %1521 = vst [vmem:[#allocation13 + $0x40] sm:$0xff] %v4220_v56 }
 0x165   : > { %3390 = vmatpush3.bf16.msra.mxu0 %v3901_v17  ;;  %3753 = vmatpush3.bf16.msra.mxu1 %v3901_v17  ;;  %1522 = vst [vmem:[#allocation13 + $0x48] sm:$0xff] %v4220_v56  ;;  %1523 = vst [vmem:[#allocation13 + $0x50] sm:$0xff] %v4220_v56 }
 0x166   : > { %3391 = vmatprep.subr.bf16.mxu0 %v3902_v18  ;;  %3746 = vmatprep.subr.bf16.mxu1 %v3902_v18  ;;  %1524 = vst [vmem:[#allocation13 + $0x58] sm:$0xff] %v4220_v56  ;;  %1525 = vst [vmem:[#allocation13 + $0x60] sm:$0xff] %v4220_v56 }
 0x167   : > { %1526 = vst [vmem:[#allocation13 + $0x68] sm:$0xff] %v4220_v56  ;;  %1527 = vst [vmem:[#allocation13 + $0x70] sm:$0xff] %v4220_v56 }
 0x168   : > { %1528 = vst [vmem:[#allocation13 + $0x78] sm:$0xff] %v4220_v56  ;;  %1529 = vst [vmem:[#allocation13 + $0x80] sm:$0xff] %v4220_v56 }
 0x169   : > { %3392 = vmatpush3.bf16.msra.mxu0 %v3903_v21  ;;  %3754 = vmatpush3.bf16.msra.mxu1 %v3903_v21  ;;  %1530 = vst [vmem:[#allocation13 + $0x88] sm:$0xff] %v4220_v56  ;;  %1531 = vst [vmem:[#allocation13 + $0x90] sm:$0xff] %v4220_v56 }
 0x16a   : > { %3393 = vmatprep.subr.bf16.mxu0 %v3904_v22  ;;  %3747 = vmatprep.subr.bf16.mxu1 %v3904_v22  ;;  %1532 = vst [vmem:[#allocation13 + $0x98] sm:$0xff] %v4220_v56  ;;  %1533 = vst [vmem:[#allocation13 + $0xa0] sm:$0xff] %v4220_v56 }
 0x16b   : > { %1534 = vst [vmem:[#allocation13 + $0xa8] sm:$0xff] %v4220_v56  ;;  %1535 = vst [vmem:[#allocation13 + $0xb0] sm:$0xff] %v4220_v56 }
 0x16c   : > { %1536 = vst [vmem:[#allocation13 + $0xb8] sm:$0xff] %v4220_v56  ;;  %1537 = vst [vmem:[#allocation13 + $0xc0] sm:$0xff] %v4220_v56 }
 0x16d   : > { %3394 = vmatpush3.bf16.msra.mxu0 %v3905_v23  ;;  %3755 = vmatpush3.bf16.msra.mxu1 %v3905_v23  ;;  %1538 = vst [vmem:[#allocation13 + $0xc8] sm:$0xff] %v4220_v56  ;;  %1539 = vst [vmem:[#allocation13 + $0xd0] sm:$0xff] %v4220_v56 }
 0x16e   : > { %3395 = vmatprep.subr.bf16.mxu0 %v3906_v24  ;;  %3748 = vmatprep.subr.bf16.mxu1 %v3906_v24  ;;  %1540 = vst [vmem:[#allocation13 + $0xd8] sm:$0xff] %v4220_v56  ;;  %1541 = vst [vmem:[#allocation13 + $0xe0] sm:$0xff] %v4220_v56 }
 0x16f   : > { %1542 = vst [vmem:[#allocation13 + $0xe8] sm:$0xff] %v4220_v56  ;;  %1543 = vst [vmem:[#allocation13 + $0xf0] sm:$0xff] %v4220_v56 }
 0x170   : > { %1544 = vst [vmem:[#allocation13 + $0xf8] sm:$0xff] %v4220_v56 }
 0x171   : > { %3396 = vmatpush3.bf16.msra.mxu0 %v3907_v25  ;;  %3756 = vmatpush3.bf16.msra.mxu1 %v3907_v25 }
 0x174   : > { %1189 = vmatmul.mubr.bf16.vlgmr.msra.gmra.mxu0 %v3908_v26  ;;  %1253 = vmatmul.mubr.bf16.vlgmr.msra.gmra.mxu1 %v3911_v27 }
 0x175   : > { %1196 = vmatprep.mubr.bf16.mxu0 %v3914_v28  ;;  %1260 = vmatprep.mubr.bf16.mxu1 %v3916_v29 }
 0x17c   : > { %1197 = vmatmul.mubr.bf16.gmra.mxu0 %v3918_v30  ;;  %1261 = vmatmul.mubr.bf16.gmra.mxu1 %v3919_v31 }
 0x17d   : > { %1204 = vmatprep.mubr.bf16.mxu0 %v3920_v32  ;;  %1268 = vmatprep.mubr.bf16.mxu1 %v3922_v33 }
 0x184   : > { %1205 = vmatmul.mubr.bf16.gmra.mxu0 %v3924_v34  ;;  %1269 = vmatmul.mubr.bf16.gmra.mxu1 %v3925_v35 }
 0x185   : > { %1212 = vmatprep.mubr.bf16.mxu0 %v3926_v36  ;;  %1276 = vmatprep.mubr.bf16.mxu1 %v3928_v37 }
 0x18c   : > { %1213 = vmatmul.mubr.bf16.gmra.mxu0 %v3930_v38  ;;  %1277 = vmatmul.mubr.bf16.gmra.mxu1 %v3931_v39 }
 0x18d   : > { %1220 = vmatprep.mubr.bf16.mxu0 %v3932_v40  ;;  %1284 = vmatprep.mubr.bf16.mxu1 %v3934_v41 }
 0x194   : > { %1221 = vmatmul.mubr.bf16.gmra.mxu0 %v3936_v42  ;;  %1285 = vmatmul.mubr.bf16.gmra.mxu1 %v3937_v43 }
 0x195   : > { %1228 = vmatprep.mubr.bf16.mxu0 %v3938_v44  ;;  %1292 = vmatprep.mubr.bf16.mxu1 %v3940_v45 }
 0x19c   : > { %1229 = vmatmul.mubr.bf16.gmra.mxu0 %v3942_v46  ;;  %1293 = vmatmul.mubr.bf16.gmra.mxu1 %v3943_v47 }
 0x19d   : > { %1236 = vmatprep.mubr.bf16.mxu0 %v3944_v48  ;;  %1300 = vmatprep.mubr.bf16.mxu1 %v3946_v49 }
 0x1a4   : > { %1237 = vmatmul.mubr.bf16.gmra.mxu0 %v3948_v50  ;;  %1301 = vmatmul.mubr.bf16.gmra.mxu1 %v3949_v51 }
 0x1a5   : > { %1244 = vmatprep.mubr.bf16.mxu0 %v3950_v52  ;;  %1308 = vmatprep.mubr.bf16.mxu1 %v3952_v53 }
 0x1ac   : > { %1245 = vmatmul.mubr.bf16.gmra.mxu0 %v3954_v54  ;;  %1309 = vmatmul.mubr.bf16.gmra.mxu1 %v3955_v55 }
 0x234   : > { %v3397_v57 = vpop.f32.mrf.mxu0  ;;  %v3445_v58 = vpop.f32.mrf.mxu1 }
 0x236   : > { %v3398_v59 = vpop.f32.mrf.mxu0  ;;  %v3446_v60 = vpop.f32.mrf.mxu1 }
 0x237   : > { %v3399_v62 = vadd.f32 %v3398_v59, %v3397_v57  ;;  %v3447_v63 = vadd.f32 %v3446_v60, %v3445_v58 }
 0x238   : > { %v3400_v0 = vpop.f32.mrf.mxu0  ;;  %v3448_v1 = vpop.f32.mrf.mxu1 }
 0x239   : > { %v1191_v2 = vadd.f32 %v3399_v62, %v4366_v61  ;;  %v1255_v3 = vadd.f32 %v3447_v63, %v4366_v61 }
 0x23a   : > { %v3401_v4 = vpop.f32.mrf.mxu0  ;;  %v3449_v5 = vpop.f32.mrf.mxu1 }
 0x23b   : > { %v3402_v6 = vadd.f32 %v3401_v4, %v3400_v0  ;;  %v3450_v7 = vadd.f32 %v3449_v5, %v3448_v1  ;;  %v1317_v12 = vmax.f32 %v1191_v2, 0.0  ;;  %v1333_v13 = vmax.f32 %v1255_v3, 0.0 }
 0x23c   : > { %v3403_v8 = vpop.f32.mrf.mxu0  ;;  %v3451_v9 = vpop.f32.mrf.mxu1 }
 0x23d   : > { %v1194_v10 = vadd.f32 %v3402_v6, %v4366_v61  ;;  %v1258_v11 = vadd.f32 %v3450_v7, %v4366_v61 }
 0x23e   : > { %v3404_v14 = vpop.f32.mrf.mxu0  ;;  %v3452_v15 = vpop.f32.mrf.mxu1 }
 0x23f   : > { %v1318_v16 = vmax.f32 %v1194_v10, 0.0  ;;  %v1334_v17 = vmax.f32 %v1258_v11, 0.0  ;;  %v3405_v18 = vadd.f32 %v3404_v14, %v3403_v8  ;;  %v3453_v19 = vadd.f32 %v3452_v15, %v3451_v9 }
 0x240   : > { %v3406_v20 = vpop.f32.mrf.mxu0  ;;  %v3454_v21 = vpop.f32.mrf.mxu1 }
 0x241   : > { %v3155_v22 = vpack.c.bf16 %v1318_v16, %v1317_v12  ;;  %v3195_v23 = vpack.c.bf16 %v1334_v17, %v1333_v13  ;;  %v1199_v24 = vadd.f32 %v3405_v18, %v4366_v61  ;;  %v1263_v25 = vadd.f32 %v3453_v19, %v4366_v61 }
 0x242   : > { %v3407_v26 = vpop.f32.mrf.mxu0  ;;  %v3455_v27 = vpop.f32.mrf.mxu1 }
 0x243   : > { %3156 = vst [vmem:[#allocation3] sm:$0xff] %v3155_v22   ;;  %3334 = vst [vmem:[#allocation3 + $0x40] sm:$0xff] %v3195_v23   ;;  %v3408_v28 = vadd.f32 %v3407_v26, %v3406_v20  ;;  %v3456_v29 = vadd.f32 %v3455_v27, %v3454_v21  ;;  %v1319_v34 = vmax.f32 %v1199_v24, 0.0  ;;  %v1335_v35 = vmax.f32 %v1263_v25, 0.0 }
 0x244   : > { %v3409_v30 = vpop.f32.mrf.mxu0  ;;  %v3457_v31 = vpop.f32.mrf.mxu1 }
 0x245   : > { %v1202_v32 = vadd.f32 %v3408_v28, %v4366_v61  ;;  %v1266_v33 = vadd.f32 %v3456_v29, %v4366_v61 }
 0x246   : > { %v3410_v36 = vpop.f32.mrf.mxu0  ;;  %v3458_v37 = vpop.f32.mrf.mxu1 }
 0x247   : > { %v1320_v38 = vmax.f32 %v1202_v32, 0.0  ;;  %v1336_v39 = vmax.f32 %v1266_v33, 0.0  ;;  %v3411_v40 = vadd.f32 %v3410_v36, %v3409_v30  ;;  %v3459_v41 = vadd.f32 %v3458_v37, %v3457_v31 }
 0x248   : > { %v3412_v42 = vpop.f32.mrf.mxu0  ;;  %v3460_v43 = vpop.f32.mrf.mxu1 }
 0x249   : > { %v3160_v44 = vpack.c.bf16 %v1320_v38, %v1319_v34  ;;  %v3200_v45 = vpack.c.bf16 %v1336_v39, %v1335_v35  ;;  %v1207_v46 = vadd.f32 %v3411_v40, %v4366_v61  ;;  %v1271_v47 = vadd.f32 %v3459_v41, %v4366_v61 }
 0x24a   : > { %v3413_v48 = vpop.f32.mrf.mxu0  ;;  %v3461_v49 = vpop.f32.mrf.mxu1 }
 0x24b   : > { %3327 = vst [vmem:[#allocation3 + $0x8] sm:$0xff] %v3160_v44   ;;  %3335 = vst [vmem:[#allocation3 + $0x48] sm:$0xff] %v3200_v45   ;;  %v3414_v50 = vadd.f32 %v3413_v48, %v3412_v42  ;;  %v3462_v51 = vadd.f32 %v3461_v49, %v3460_v43  ;;  %v1321_v56 = vmax.f32 %v1207_v46, 0.0  ;;  %v1337_v57 = vmax.f32 %v1271_v47, 0.0 }
 0x24c   : > { %v3415_v52 = vpop.f32.mrf.mxu0  ;;  %v3463_v53 = vpop.f32.mrf.mxu1 }
 0x24d   : > { %v1210_v54 = vadd.f32 %v3414_v50, %v4366_v61  ;;  %v1274_v55 = vadd.f32 %v3462_v51, %v4366_v61 }
 0x24e   : > { %v3416_v58 = vpop.f32.mrf.mxu0  ;;  %v3464_v59 = vpop.f32.mrf.mxu1 }
 0x24f   : > { %v1322_v60 = vmax.f32 %v1210_v54, 0.0  ;;  %v1338_v62 = vmax.f32 %v1274_v55, 0.0  ;;  %v3417_v63 = vadd.f32 %v3416_v58, %v3415_v52  ;;  %v3465_v0 = vadd.f32 %v3464_v59, %v3463_v53 }
 0x250   : > { %v3418_v1 = vpop.f32.mrf.mxu0  ;;  %v3466_v2 = vpop.f32.mrf.mxu1 }
 0x251   : > { %v3165_v3 = vpack.c.bf16 %v1322_v60, %v1321_v56  ;;  %v3205_v4 = vpack.c.bf16 %v1338_v62, %v1337_v57  ;;  %v1215_v5 = vadd.f32 %v3417_v63, %v4366_v61  ;;  %v1279_v6 = vadd.f32 %v3465_v0, %v4366_v61 }
 0x252   : > { %v3419_v7 = vpop.f32.mrf.mxu0  ;;  %v3467_v8 = vpop.f32.mrf.mxu1 }
 0x253   : > { %3328 = vst [vmem:[#allocation3 + $0x10] sm:$0xff] %v3165_v3   ;;  %3336 = vst [vmem:[#allocation3 + $0x50] sm:$0xff] %v3205_v4   ;;  %v3420_v9 = vadd.f32 %v3419_v7, %v3418_v1  ;;  %v3468_v10 = vadd.f32 %v3467_v8, %v3466_v2  ;;  %v1323_v15 = vmax.f32 %v1215_v5, 0.0  ;;  %v1339_v16 = vmax.f32 %v1279_v6, 0.0 }
 0x254   : > { %v3421_v11 = vpop.f32.mrf.mxu0  ;;  %v3469_v12 = vpop.f32.mrf.mxu1 }
 0x255   : > { %v1218_v13 = vadd.f32 %v3420_v9, %v4366_v61  ;;  %v1282_v14 = vadd.f32 %v3468_v10, %v4366_v61 }
 0x256   : > { %v3422_v17 = vpop.f32.mrf.mxu0  ;;  %v3470_v18 = vpop.f32.mrf.mxu1 }
 0x257   : > { %v1324_v19 = vmax.f32 %v1218_v13, 0.0  ;;  %v1340_v20 = vmax.f32 %v1282_v14, 0.0  ;;  %v3423_v21 = vadd.f32 %v3422_v17, %v3421_v11  ;;  %v3471_v22 = vadd.f32 %v3470_v18, %v3469_v12 }
 0x258   : > { %v3424_v23 = vpop.f32.mrf.mxu0  ;;  %v3472_v24 = vpop.f32.mrf.mxu1 }
 0x259   : > { %v3170_v25 = vpack.c.bf16 %v1324_v19, %v1323_v15  ;;  %v3210_v26 = vpack.c.bf16 %v1340_v20, %v1339_v16  ;;  %v1223_v27 = vadd.f32 %v3423_v21, %v4366_v61  ;;  %v1287_v28 = vadd.f32 %v3471_v22, %v4366_v61 }
 0x25a   : > { %v3425_v29 = vpop.f32.mrf.mxu0  ;;  %v3473_v30 = vpop.f32.mrf.mxu1 }
 0x25b   : > { %3329 = vst [vmem:[#allocation3 + $0x18] sm:$0xff] %v3170_v25   ;;  %3337 = vst [vmem:[#allocation3 + $0x58] sm:$0xff] %v3210_v26   ;;  %v3426_v31 = vadd.f32 %v3425_v29, %v3424_v23  ;;  %v3474_v32 = vadd.f32 %v3473_v30, %v3472_v24  ;;  %v1325_v37 = vmax.f32 %v1223_v27, 0.0  ;;  %v1341_v38 = vmax.f32 %v1287_v28, 0.0 }
 0x25c   : > { %v3427_v33 = vpop.f32.mrf.mxu0  ;;  %v3475_v34 = vpop.f32.mrf.mxu1 }
 0x25d   : > { %v1226_v35 = vadd.f32 %v3426_v31, %v4366_v61  ;;  %v1290_v36 = vadd.f32 %v3474_v32, %v4366_v61 }
 0x25e   : > { %v3428_v39 = vpop.f32.mrf.mxu0  ;;  %v3476_v40 = vpop.f32.mrf.mxu1 }
 0x25f   : > { %v1326_v41 = vmax.f32 %v1226_v35, 0.0  ;;  %v1342_v42 = vmax.f32 %v1290_v36, 0.0  ;;  %v3429_v43 = vadd.f32 %v3428_v39, %v3427_v33  ;;  %v3477_v44 = vadd.f32 %v3476_v40, %v3475_v34 }
 0x260   : > { %v3430_v45 = vpop.f32.mrf.mxu0  ;;  %v3478_v46 = vpop.f32.mrf.mxu1 }
 0x261   : > { %v3175_v47 = vpack.c.bf16 %v1326_v41, %v1325_v37  ;;  %v3215_v48 = vpack.c.bf16 %v1342_v42, %v1341_v38  ;;  %v1231_v49 = vadd.f32 %v3429_v43, %v4366_v61  ;;  %v1295_v50 = vadd.f32 %v3477_v44, %v4366_v61 }
 0x262   : > { %v3431_v51 = vpop.f32.mrf.mxu0  ;;  %v3479_v52 = vpop.f32.mrf.mxu1 }
 0x263   : > { %3330 = vst [vmem:[#allocation3 + $0x20] sm:$0xff] %v3175_v47   ;;  %3338 = vst [vmem:[#allocation3 + $0x60] sm:$0xff] %v3215_v48   ;;  %v3432_v53 = vadd.f32 %v3431_v51, %v3430_v45  ;;  %v3480_v54 = vadd.f32 %v3479_v52, %v3478_v46  ;;  %v1327_v59 = vmax.f32 %v1231_v49, 0.0  ;;  %v1343_v60 = vmax.f32 %v1295_v50, 0.0 }
 0x264   : > { %v3433_v55 = vpop.f32.mrf.mxu0  ;;  %v3481_v56 = vpop.f32.mrf.mxu1 }
 0x265   : > { %v1234_v57 = vadd.f32 %v3432_v53, %v4366_v61  ;;  %v1298_v58 = vadd.f32 %v3480_v54, %v4366_v61 }
 0x266   : > { %v3434_v62 = vpop.f32.mrf.mxu0  ;;  %v3482_v63 = vpop.f32.mrf.mxu1 }
 0x267   : > { %v1328_v0 = vmax.f32 %v1234_v57, 0.0  ;;  %v1344_v1 = vmax.f32 %v1298_v58, 0.0  ;;  %v3435_v2 = vadd.f32 %v3434_v62, %v3433_v55  ;;  %v3483_v3 = vadd.f32 %v3482_v63, %v3481_v56 }
 0x268   : > { %v3436_v4 = vpop.f32.mrf.mxu0  ;;  %v3484_v5 = vpop.f32.mrf.mxu1 }
 0x269   : > { %v3180_v6 = vpack.c.bf16 %v1328_v0, %v1327_v59  ;;  %v3220_v7 = vpack.c.bf16 %v1344_v1, %v1343_v60  ;;  %v1239_v8 = vadd.f32 %v3435_v2, %v4366_v61  ;;  %v1303_v9 = vadd.f32 %v3483_v3, %v4366_v61 }
 0x26a   : > { %v3437_v10 = vpop.f32.mrf.mxu0  ;;  %v3485_v11 = vpop.f32.mrf.mxu1 }
 0x26b   : > { %3331 = vst [vmem:[#allocation3 + $0x28] sm:$0xff] %v3180_v6   ;;  %3339 = vst [vmem:[#allocation3 + $0x68] sm:$0xff] %v3220_v7   ;;  %v3438_v12 = vadd.f32 %v3437_v10, %v3436_v4  ;;  %v3486_v13 = vadd.f32 %v3485_v11, %v3484_v5  ;;  %v1329_v18 = vmax.f32 %v1239_v8, 0.0  ;;  %v1345_v19 = vmax.f32 %v1303_v9, 0.0 }
 0x26c   : > { %v3439_v14 = vpop.f32.mrf.mxu0  ;;  %v3487_v15 = vpop.f32.mrf.mxu1 }
 0x26d   : > { %v1242_v16 = vadd.f32 %v3438_v12, %v4366_v61  ;;  %v1306_v17 = vadd.f32 %v3486_v13, %v4366_v61 }
 0x26e   : > { %v3440_v20 = vpop.f32.mrf.mxu0  ;;  %v3488_v21 = vpop.f32.mrf.mxu1 }
 0x26f   : > { %v1330_v22 = vmax.f32 %v1242_v16, 0.0  ;;  %v1346_v23 = vmax.f32 %v1306_v17, 0.0  ;;  %v3441_v24 = vadd.f32 %v3440_v20, %v3439_v14  ;;  %v3489_v25 = vadd.f32 %v3488_v21, %v3487_v15 }
 0x270   : > { %v3442_v26 = vpop.f32.mrf.mxu0  ;;  %v3490_v27 = vpop.f32.mrf.mxu1 }
 0x271   : > { %v3185_v28 = vpack.c.bf16 %v1330_v22, %v1329_v18  ;;  %v3225_v29 = vpack.c.bf16 %v1346_v23, %v1345_v19  ;;  %v1247_v32 = vadd.f32 %v3441_v24, %v4366_v61  ;;  %v1311_v33 = vadd.f32 %v3489_v25, %v4366_v61 }
 0x272   : > { %v3443_v30 = vpop.f32.mrf.mxu0  ;;  %v3491_v31 = vpop.f32.mrf.mxu1 }
 0x273   : > { %3332 = vst [vmem:[#allocation3 + $0x30] sm:$0xff] %v3185_v28   ;;  %3340 = vst [vmem:[#allocation3 + $0x70] sm:$0xff] %v3225_v29   ;;  %v3444_v34 = vadd.f32 %v3443_v30, %v3442_v26  ;;  %v3492_v35 = vadd.f32 %v3491_v31, %v3490_v27  ;;  %v1331_v38 = vmax.f32 %v1247_v32, 0.0  ;;  %v1347_v39 = vmax.f32 %v1311_v33, 0.0 }
 0x275   : > { %v1250_v36 = vadd.f32 %v3444_v34, %v4366_v61  ;;  %v1314_v37 = vadd.f32 %v3492_v35, %v4366_v61 }
 0x277   : > { %v1332_v40 = vmax.f32 %v1250_v36, 0.0  ;;  %v1348_v41 = vmax.f32 %v1314_v37, 0.0 }
 0x279   : > { %v3190_v42 = vpack.c.bf16 %v1332_v40, %v1331_v38  ;;  %v3230_v43 = vpack.c.bf16 %v1348_v41, %v1347_v39 }
 0x27b   : > { %3333 = vst [vmem:[#allocation3 + $0x38] sm:$0xff] %v3190_v42   ;;  %3341 = vst [vmem:[#allocation3 + $0x78] sm:$0xff] %v3230_v43  }
 0x27c PF: > { %p1545_p5 = scmp.eq.s32.totalorder %s4202_s21, 1 }
 0x27d   : > { %v3956_v44 = vld [vmem:[#allocation11 + $0x38] sm:$0xff] (%p1545_p5)   ;;  %v3957_v45 = vld [vmem:[#allocation11 + $0x30] sm:$0xff] (%p1545_p5)   ;;  %v3958_v61 = vld [vmem:[#allocation11 + $0x28] sm:$0xff] (%p1545_p5)  }
 0x27e   : > { %1549 = sbr.rel (!%p1545_p5) target bundleno = 896 (0x380), region = 72  ;;  %3677 = vmatprep.subr.bf16.mxu0 (%p1545_p5), %v3956_v44  ;;  %3757 = vmatprep.subr.bf16.mxu1 (%p1545_p5), %v3956_v44  ;;  %v3959_v46 = vld [vmem:[#allocation11 + $0x20] sm:$0xff] (%p1545_p5)   ;;  %v3960_v49 = vld [vmem:[#allocation11 + $0x18] sm:$0xff] (%p1545_p5)   ;;  %v3961_v50 = vld [vmem:[#allocation11 + $0x10] sm:$0xff] (%p1545_p5)  }
 0x27f   : > { %3678 = vmatpush3.bf16.msra.mxu0 (%p1545_p5), %v3956_v44  ;;  %3765 = vmatpush3.bf16.msra.mxu1 (%p1545_p5), %v3956_v44  ;;  %v3964_v47 = vld [vmem:[#allocation3] sm:$0xff] (%p1545_p5)   ;;  %v3962_v51 = vld [vmem:[#allocation11 + $0x8] sm:$0xff] (%p1545_p5)   ;;  %v3968_v55 = vld [vmem:[#allocation3 + $0x10] sm:$0xff] (%p1545_p5)  }
 0x280   : > { %3679 = vmatprep.subr.bf16.mxu0 (%p1545_p5), %v3957_v45  ;;  %3758 = vmatprep.subr.bf16.mxu1 (%p1545_p5), %v3957_v45  ;;  %v3965_v48 = vld [vmem:[#allocation3 + $0x40] sm:$0xff] (%p1545_p5)   ;;  %v3966_v53 = vld [vmem:[#allocation3 + $0x8] sm:$0xff] (%p1545_p5)   ;;  %v3969_v56 = vld [vmem:[#allocation3 + $0x50] sm:$0xff] (%p1545_p5)  }
 0x281   : > { %3693 = vmatprep.mubr.bf16.mxu0 (%p1545_p5), %v3964_v47  ;;  %3709 = vmatprep.mubr.bf16.mxu1 (%p1545_p5), %v3965_v48  ;;  %v3963_v52 = vld [vmem:[#allocation11] sm:$0xff] (%p1545_p5)   ;;  %v3967_v54 = vld [vmem:[#allocation3 + $0x48] sm:$0xff] (%p1545_p5)   ;;  %v3970_v57 = vld [vmem:[#allocation3 + $0x18] sm:$0xff] (%p1545_p5)  }
 0x282   : > { %v3971_v58 = vld [vmem:[#allocation3 + $0x58] sm:$0xff] (%p1545_p5)   ;;  %v3972_v59 = vld [vmem:[#allocation3 + $0x20] sm:$0xff] (%p1545_p5)   ;;  %v3974_v62 = vld [vmem:[#allocation3 + $0x28] sm:$0xff] (%p1545_p5)  }
 0x283   : > { %3680 = vmatpush3.bf16.msra.mxu0 %v3957_v45  ;;  %3766 = vmatpush3.bf16.msra.mxu1 %v3957_v45  ;;  %v3973_v60 = vld [vmem:[#allocation3 + $0x60] sm:$0xff]   ;;  %v3975_v63 = vld [vmem:[#allocation3 + $0x68] sm:$0xff]   ;;  %v3976_v0 = vld [vmem:[#allocation3 + $0x30] sm:$0xff]  }
 0x284   : > { %3681 = vmatprep.subr.bf16.mxu0 %v3958_v61  ;;  %3759 = vmatprep.subr.bf16.mxu1 %v3958_v61  ;;  %v3977_v1 = vld [vmem:[#allocation3 + $0x70] sm:$0xff]   ;;  %v3978_v2 = vld [vmem:[#allocation3 + $0x38] sm:$0xff]  }
 0x285   : > { %v3979_v3 = vld [vmem:[#allocation3 + $0x78] sm:$0xff]  }
 0x287   : > { %3682 = vmatpush3.bf16.msra.mxu0 %v3958_v61  ;;  %3767 = vmatpush3.bf16.msra.mxu1 %v3958_v61 }
 0x288   : > { %3683 = vmatprep.subr.bf16.mxu0 %v3959_v46  ;;  %3760 = vmatprep.subr.bf16.mxu1 %v3959_v46 }
 0x28b   : > { %3684 = vmatpush3.bf16.msra.mxu0 %v3959_v46  ;;  %3768 = vmatpush3.bf16.msra.mxu1 %v3959_v46 }
 0x28c   : > { %3685 = vmatprep.subr.bf16.mxu0 %v3960_v49  ;;  %3761 = vmatprep.subr.bf16.mxu1 %v3960_v49 }
 0x28f   : > { %3686 = vmatpush3.bf16.msra.mxu0 %v3960_v49  ;;  %3769 = vmatpush3.bf16.msra.mxu1 %v3960_v49 }
 0x290   : > { %3687 = vmatprep.subr.bf16.mxu0 %v3961_v50  ;;  %3762 = vmatprep.subr.bf16.mxu1 %v3961_v50 }
 0x293   : > { %3688 = vmatpush3.bf16.msra.mxu0 %v3961_v50  ;;  %3770 = vmatpush3.bf16.msra.mxu1 %v3961_v50 }
 0x294   : > { %3689 = vmatprep.subr.bf16.mxu0 %v3962_v51  ;;  %3763 = vmatprep.subr.bf16.mxu1 %v3962_v51 }
 0x297   : > { %3690 = vmatpush3.bf16.msra.mxu0 %v3962_v51  ;;  %3771 = vmatpush3.bf16.msra.mxu1 %v3962_v51 }
 0x298   : > { %3691 = vmatprep.subr.bf16.mxu0 %v3963_v52  ;;  %3764 = vmatprep.subr.bf16.mxu1 %v3963_v52 }
 0x29b   : > { %3692 = vmatpush3.bf16.msra.mxu0 %v3963_v52  ;;  %3772 = vmatpush3.bf16.msra.mxu1 %v3963_v52 }
 0x29e   : > { %3694 = vmatmul.mubr.bf16.vlgmr.msra.gmra.mxu0 %v3966_v53  ;;  %3710 = vmatmul.mubr.bf16.vlgmr.msra.gmra.mxu1 %v3967_v54 }
 0x29f   : > { %3697 = vmatprep.mubr.bf16.mxu0 %v3968_v55  ;;  %3713 = vmatprep.mubr.bf16.mxu1 %v3969_v56 }
 0x2a6   : > { %3698 = vmatmul.mubr.bf16.gmra.mxu0 %v3970_v57  ;;  %3714 = vmatmul.mubr.bf16.gmra.mxu1 %v3971_v58 }
 0x2a7   : > { %3701 = vmatprep.mubr.bf16.mxu0 %v3972_v59  ;;  %3717 = vmatprep.mubr.bf16.mxu1 %v3973_v60 }
 0x2ae   : > { %3702 = vmatmul.mubr.bf16.gmra.mxu0 %v3974_v62  ;;  %3718 = vmatmul.mubr.bf16.gmra.mxu1 %v3975_v63 }
 0x2af   : > { %3705 = vmatprep.mubr.bf16.mxu0 %v3976_v0  ;;  %3721 = vmatprep.mubr.bf16.mxu1 %v3977_v1 }
 0x2b6   : > { %3706 = vmatmul.mubr.bf16.gmra.mxu0 %v3978_v2  ;;  %3722 = vmatmul.mubr.bf16.gmra.mxu1 %v3979_v3 }
 0x35e   : > { %v3695_v4 = vpop.f32.mrf.mxu0  ;;  %v3711_v5 = vpop.f32.mrf.mxu1 }
 0x360   : > { %v1776_v6 = vpop.f32.mrf.mxu0  ;;  %v1840_v7 = vpop.f32.mrf.mxu1 }
 0x362   : > { %v3696_v8 = vpop.f32.mrf.mxu0  ;;  %v3712_v9 = vpop.f32.mrf.mxu1 }
 0x363   : > { %v3240_v10 = vpack.c.bf16 %v3696_v8, %v3695_v4  ;;  %v3280_v11 = vpack.c.bf16 %v3712_v9, %v3711_v5 }
 0x364   : > { %v1779_v12 = vpop.f32.mrf.mxu0  ;;  %v1843_v13 = vpop.f32.mrf.mxu1 }
 0x365   : > { %3342 = vst [vmem:[#allocation4 + $0x8] sm:$0xff] %v3240_v10   ;;  %3350 = vst [vmem:[#allocation4 + $0x48] sm:$0xff] %v3280_v11   ;;  %v3235_v14 = vpack.c.bf16 %v1779_v12, %v1776_v6  ;;  %v3275_v15 = vpack.c.bf16 %v1843_v13, %v1840_v7 }
 0x366   : > { %v3699_v16 = vpop.f32.mrf.mxu0  ;;  %v3715_v17 = vpop.f32.mrf.mxu1 }
 0x367   : > { %3236 = vst [vmem:[#allocation4] sm:$0xff] %v3235_v14   ;;  %3349 = vst [vmem:[#allocation4 + $0x40] sm:$0xff] %v3275_v15  }
 0x368   : > { %v1792_v18 = vpop.f32.mrf.mxu0  ;;  %v1856_v19 = vpop.f32.mrf.mxu1 }
 0x36a   : > { %v3700_v20 = vpop.f32.mrf.mxu0  ;;  %v3716_v21 = vpop.f32.mrf.mxu1 }
 0x36b   : > { %v3250_v22 = vpack.c.bf16 %v3700_v20, %v3699_v16  ;;  %v3290_v23 = vpack.c.bf16 %v3716_v21, %v3715_v17 }
 0x36c   : > { %v1795_v24 = vpop.f32.mrf.mxu0  ;;  %v1859_v25 = vpop.f32.mrf.mxu1 }
 0x36d   : > { %3344 = vst [vmem:[#allocation4 + $0x18] sm:$0xff] %v3250_v22   ;;  %3352 = vst [vmem:[#allocation4 + $0x58] sm:$0xff] %v3290_v23   ;;  %v3245_v26 = vpack.c.bf16 %v1795_v24, %v1792_v18  ;;  %v3285_v27 = vpack.c.bf16 %v1859_v25, %v1856_v19 }
 0x36e   : > { %v3703_v28 = vpop.f32.mrf.mxu0  ;;  %v3719_v29 = vpop.f32.mrf.mxu1 }
 0x36f   : > { %3343 = vst [vmem:[#allocation4 + $0x10] sm:$0xff] %v3245_v26   ;;  %3351 = vst [vmem:[#allocation4 + $0x50] sm:$0xff] %v3285_v27  }
 0x370   : > { %v1808_v30 = vpop.f32.mrf.mxu0  ;;  %v1872_v31 = vpop.f32.mrf.mxu1 }
 0x372   : > { %v3704_v32 = vpop.f32.mrf.mxu0  ;;  %v3720_v33 = vpop.f32.mrf.mxu1 }
 0x373   : > { %v3260_v34 = vpack.c.bf16 %v3704_v32, %v3703_v28  ;;  %v3300_v35 = vpack.c.bf16 %v3720_v33, %v3719_v29 }
 0x374   : > { %v1811_v36 = vpop.f32.mrf.mxu0  ;;  %v1875_v37 = vpop.f32.mrf.mxu1 }
 0x375   : > { %3346 = vst [vmem:[#allocation4 + $0x28] sm:$0xff] %v3260_v34   ;;  %3354 = vst [vmem:[#allocation4 + $0x68] sm:$0xff] %v3300_v35   ;;  %v3255_v38 = vpack.c.bf16 %v1811_v36, %v1808_v30  ;;  %v3295_v39 = vpack.c.bf16 %v1875_v37, %v1872_v31 }
 0x376   : > { %v3707_v40 = vpop.f32.mrf.mxu0  ;;  %v3723_v41 = vpop.f32.mrf.mxu1 }
 0x377   : > { %3345 = vst [vmem:[#allocation4 + $0x20] sm:$0xff] %v3255_v38   ;;  %3353 = vst [vmem:[#allocation4 + $0x60] sm:$0xff] %v3295_v39  }
 0x378   : > { %v1824_v42 = vpop.f32.mrf.mxu0  ;;  %v1888_v43 = vpop.f32.mrf.mxu1 }
 0x37a   : > { %v3708_v44 = vpop.f32.mrf.mxu0  ;;  %v3724_v45 = vpop.f32.mrf.mxu1 }
 0x37b   : > { %v3270_v61 = vpack.c.bf16 %v3708_v44, %v3707_v40  ;;  %v3310_v46 = vpack.c.bf16 %v3724_v45, %v3723_v41 }
 0x37c   : > { %v1827_v47 = vpop.f32.mrf.mxu0  ;;  %v1891_v48 = vpop.f32.mrf.mxu1 }
 0x37d   : > { %3348 = vst [vmem:[#allocation4 + $0x38] sm:$0xff] %v3270_v61   ;;  %3356 = vst [vmem:[#allocation4 + $0x78] sm:$0xff] %v3310_v46   ;;  %v3265_v49 = vpack.c.bf16 %v1827_v47, %v1824_v42  ;;  %v3305_v50 = vpack.c.bf16 %v1891_v48, %v1888_v43 }
 0x37f   : > { %3347 = vst [vmem:[#allocation4 + $0x30] sm:$0xff] %v3265_v49   ;;  %3355 = vst [vmem:[#allocation4 + $0x70] sm:$0xff] %v3305_v50  }
 0x380 PF: > { %p2920_p7 = scmp.ne.s32.totalorder %s4202_s21, 1 }
 0x382   : > { %2065 = sbr.rel (%p2920_p7) target bundleno = 1198 (0x4ae), region = 76 }
 0x387   : > { %v3980_v51 = vld [vmem:[#allocation4 + $0x78] sm:$0xff]   ;;  %v3982_v53 = vld [vmem:[#allocation4 + $0x70] sm:$0xff]   ;;  %v3984_v55 = vld [vmem:[#allocation4 + $0x68] sm:$0xff]  }
 0x388   : > { %v3981_v52 = vld [vmem:[#allocation4 + $0x38] sm:$0xff]   ;;  %3517 = vmatprep.subr.bf16.mxu0 %v3980_v51  ;;  %3773 = vmatprep.subr.bf16.mxu1 %v3980_v51  ;;  %v3983_v54 = vld [vmem:[#allocation4 + $0x30] sm:$0xff]   ;;  %v3985_v56 = vld [vmem:[#allocation4 + $0x28] sm:$0xff]  }
 0x389   : > { %3518 = vmatpush3.bf16.msra.mxu0 %v3981_v52  ;;  %3781 = vmatpush3.bf16.msra.mxu1 %v3981_v52  ;;  %v3986_v57 = vld [vmem:[#allocation4 + $0x60] sm:$0xff]   ;;  %v3988_v59 = vld [vmem:[#allocation4 + $0x58] sm:$0xff]   ;;  %v3990_v62 = vld [vmem:[#allocation4 + $0x50] sm:$0xff]  }
 0x38a   : > { %3519 = vmatprep.subr.bf16.mxu0 %v3982_v53  ;;  %3774 = vmatprep.subr.bf16.mxu1 %v3982_v53  ;;  %v3987_v58 = vld [vmem:[#allocation4 + $0x20] sm:$0xff]   ;;  %v3989_v60 = vld [vmem:[#allocation4 + $0x18] sm:$0xff]   ;;  %v3991_v1 = vld [vmem:[#allocation4 + $0x10] sm:$0xff]  }
 0x38b   : > { %v3998_v63 = vld [vmem:[#allocation5 + $0x4] ss:$8 sps:$4 sm:$0xff]   ;;  %v3996_v6 = vld [vmem:[#allocation5] ss:$8 sps:$4 sm:$0xff]   ;;  %v4002_v8 = vld [vmem:[#allocation5 + $0x14] ss:$8 sps:$4 sm:$0xff]  }
 0x38c   : > { %v4001_v0 = vld [vmem:[#allocation5 + $0x84] ss:$8 sps:$4 sm:$0xff]   ;;  %2425 = vmatprep.mubr.bf16.mxu0 %v3998_v63  ;;  %v3999_v7 = vld [vmem:[#allocation5 + $0x80] ss:$8 sps:$4 sm:$0xff]   ;;  %v4004_v9 = vld [vmem:[#allocation5 + $0x94] ss:$8 sps:$4 sm:$0xff]  }
 0x38d   : > { %3520 = vmatpush3.bf16.msra.mxu0 %v3983_v54  ;;  %3782 = vmatpush3.bf16.msra.mxu1 %v3983_v54  ;;  %v3992_v2 = vld [vmem:[#allocation4 + $0x48] sm:$0xff]   ;;  %v3994_v4 = vld [vmem:[#allocation4 + $0x40] sm:$0xff]   ;;  %v4006_v10 = vld [vmem:[#allocation5 + $0x10] ss:$8 sps:$4 sm:$0xff]  }
 0x38e   : > { %3521 = vmatprep.subr.bf16.mxu0 %v3984_v55  ;;  %3775 = vmatprep.subr.bf16.mxu1 %v3984_v55  ;;  %v3993_v3 = vld [vmem:[#allocation4 + $0x8] sm:$0xff]   ;;  %v3995_v5 = vld [vmem:[#allocation4] sm:$0xff]   ;;  %v4007_v11 = vld [vmem:[#allocation5 + $0x90] ss:$8 sps:$4 sm:$0xff]  }
 0x38f   : > { %2489 = vmatprep.mubr.bf16.mxu1 %v4001_v0  ;;  %v4008_v12 = vld [vmem:[#allocation5 + $0x24] ss:$8 sps:$4 sm:$0xff]   ;;  %v4012_v14 = vld [vmem:[#allocation5 + $0x20] ss:$8 sps:$4 sm:$0xff]   ;;  %v4014_v16 = vld [vmem:[#allocation5 + $0x34] ss:$8 sps:$4 sm:$0xff]  }
 0x390   : > { %v4010_v13 = vld [vmem:[#allocation5 + $0xa4] ss:$8 sps:$4 sm:$0xff]   ;;  %v4013_v15 = vld [vmem:[#allocation5 + $0xa0] ss:$8 sps:$4 sm:$0xff]   ;;  %v4016_v17 = vld [vmem:[#allocation5 + $0xb4] ss:$8 sps:$4 sm:$0xff]  }
 0x391   : > { %3522 = vmatpush3.bf16.msra.mxu0 %v3985_v56  ;;  %3783 = vmatpush3.bf16.msra.mxu1 %v3985_v56  ;;  %v4018_v18 = vld [vmem:[#allocation5 + $0x30] ss:$8 sps:$4 sm:$0xff]   ;;  %v4020_v20 = vld [vmem:[#allocation5 + $0x44] ss:$8 sps:$4 sm:$0xff]   ;;  %v4024_v22 = vld [vmem:[#allocation5 + $0x40] ss:$8 sps:$4 sm:$0xff]  }
 0x392   : > { %3523 = vmatprep.subr.bf16.mxu0 %v3986_v57  ;;  %3776 = vmatprep.subr.bf16.mxu1 %v3986_v57  ;;  %v4019_v19 = vld [vmem:[#allocation5 + $0xb0] ss:$8 sps:$4 sm:$0xff]   ;;  %v4022_v21 = vld [vmem:[#allocation5 + $0xc4] ss:$8 sps:$4 sm:$0xff]   ;;  %v4025_v23 = vld [vmem:[#allocation5 + $0xc0] ss:$8 sps:$4 sm:$0xff]  }
 0x393   : > { %v4026_v24 = vld [vmem:[#allocation5 + $0x54] ss:$8 sps:$4 sm:$0xff]   ;;  %v4030_v26 = vld [vmem:[#allocation5 + $0x50] ss:$8 sps:$4 sm:$0xff]   ;;  %v4032_v28 = vld [vmem:[#allocation5 + $0x64] ss:$8 sps:$4 sm:$0xff]  }
 0x394   : > { %v4028_v25 = vld [vmem:[#allocation5 + $0xd4] ss:$8 sps:$4 sm:$0xff]   ;;  %v4031_v27 = vld [vmem:[#allocation5 + $0xd0] ss:$8 sps:$4 sm:$0xff]   ;;  %v4034_v29 = vld [vmem:[#allocation5 + $0xe4] ss:$8 sps:$4 sm:$0xff]  }
 0x395   : > { %3524 = vmatpush3.bf16.msra.mxu0 %v3987_v58  ;;  %3784 = vmatpush3.bf16.msra.mxu1 %v3987_v58  ;;  %v4036_v30 = vld [vmem:[#allocation5 + $0x60] ss:$8 sps:$4 sm:$0xff]   ;;  %v4038_v32 = vld [vmem:[#allocation5 + $0x74] ss:$8 sps:$4 sm:$0xff]   ;;  %v4042_v34 = vld [vmem:[#allocation5 + $0x70] ss:$8 sps:$4 sm:$0xff]  }
 0x396   : > { %3525 = vmatprep.subr.bf16.mxu0 %v3988_v59  ;;  %3777 = vmatprep.subr.bf16.mxu1 %v3988_v59  ;;  %v4037_v31 = vld [vmem:[#allocation5 + $0xe0] ss:$8 sps:$4 sm:$0xff]   ;;  %v4040_v33 = vld [vmem:[#allocation5 + $0xf4] ss:$8 sps:$4 sm:$0xff]   ;;  %v4043_v35 = vld [vmem:[#allocation5 + $0xf0] ss:$8 sps:$4 sm:$0xff]  }
 0x397   : > { %v4405_v38 = vld [vmem:[%s4470_s5] ss:$0 sm:$0xff] }
 0x399   : > { %3526 = vmatpush3.bf16.msra.mxu0 %v3989_v60  ;;  %3785 = vmatpush3.bf16.msra.mxu1 %v3989_v60 }
 0x39a   : > { %3527 = vmatprep.subr.bf16.mxu0 %v3990_v62  ;;  %3778 = vmatprep.subr.bf16.mxu1 %v3990_v62 }
 0x39d   : > { %3528 = vmatpush3.bf16.msra.mxu0 %v3991_v1  ;;  %3786 = vmatpush3.bf16.msra.mxu1 %v3991_v1 }
 0x39e   : > { %3529 = vmatprep.subr.bf16.mxu0 %v3992_v2  ;;  %3779 = vmatprep.subr.bf16.mxu1 %v3992_v2 }
 0x3a1   : > { %3530 = vmatpush3.bf16.msra.mxu0 %v3993_v3  ;;  %3787 = vmatpush3.bf16.msra.mxu1 %v3993_v3 }
 0x3a2   : > { %3531 = vmatprep.subr.bf16.mxu0 %v3994_v4  ;;  %3780 = vmatprep.subr.bf16.mxu1 %v3994_v4 }
 0x3a5   : > { %3532 = vmatpush3.bf16.msra.mxu0 %v3995_v5  ;;  %3788 = vmatpush3.bf16.msra.mxu1 %v3995_v5 }
 0x3a8   : > { %2426 = vmatmul.mubr.bf16.vlgmr.msra.gmra.mxu0 %v3996_v6  ;;  %2490 = vmatmul.mubr.bf16.vlgmr.msra.gmra.mxu1 %v3999_v7 }
 0x3a9   : > { %2433 = vmatprep.mubr.bf16.mxu0 %v4002_v8  ;;  %2497 = vmatprep.mubr.bf16.mxu1 %v4004_v9 }
 0x3b0   : > { %2434 = vmatmul.mubr.bf16.gmra.mxu0 %v4006_v10  ;;  %2498 = vmatmul.mubr.bf16.gmra.mxu1 %v4007_v11 }
 0x3b1   : > { %2441 = vmatprep.mubr.bf16.mxu0 %v4008_v12  ;;  %2505 = vmatprep.mubr.bf16.mxu1 %v4010_v13 }
 0x3b8   : > { %2442 = vmatmul.mubr.bf16.gmra.mxu0 %v4012_v14  ;;  %2506 = vmatmul.mubr.bf16.gmra.mxu1 %v4013_v15 }
 0x3b9   : > { %2449 = vmatprep.mubr.bf16.mxu0 %v4014_v16  ;;  %2513 = vmatprep.mubr.bf16.mxu1 %v4016_v17 }
 0x3c0   : > { %2450 = vmatmul.mubr.bf16.gmra.mxu0 %v4018_v18  ;;  %2514 = vmatmul.mubr.bf16.gmra.mxu1 %v4019_v19 }
 0x3c1   : > { %2457 = vmatprep.mubr.bf16.mxu0 %v4020_v20  ;;  %2521 = vmatprep.mubr.bf16.mxu1 %v4022_v21 }
 0x3c8   : > { %2458 = vmatmul.mubr.bf16.gmra.mxu0 %v4024_v22  ;;  %2522 = vmatmul.mubr.bf16.gmra.mxu1 %v4025_v23 }
 0x3c9   : > { %2465 = vmatprep.mubr.bf16.mxu0 %v4026_v24  ;;  %2529 = vmatprep.mubr.bf16.mxu1 %v4028_v25 }
 0x3d0   : > { %2466 = vmatmul.mubr.bf16.gmra.mxu0 %v4030_v26  ;;  %2530 = vmatmul.mubr.bf16.gmra.mxu1 %v4031_v27 }
 0x3d1   : > { %2473 = vmatprep.mubr.bf16.mxu0 %v4032_v28  ;;  %2537 = vmatprep.mubr.bf16.mxu1 %v4034_v29 }
 0x3d8   : > { %2474 = vmatmul.mubr.bf16.gmra.mxu0 %v4036_v30  ;;  %2538 = vmatmul.mubr.bf16.gmra.mxu1 %v4037_v31 }
 0x3d9   : > { %2481 = vmatprep.mubr.bf16.mxu0 %v4038_v32  ;;  %2545 = vmatprep.mubr.bf16.mxu1 %v4040_v33 }
 0x3e0   : > { %2482 = vmatmul.mubr.bf16.gmra.mxu0 %v4042_v34  ;;  %2546 = vmatmul.mubr.bf16.gmra.mxu1 %v4043_v35 }
 0x468   : > { %v3533_v36 = vpop.f32.mrf.mxu0  ;;  %v3581_v37 = vpop.f32.mrf.mxu1 }
 0x46a   : > { %v3534_v39 = vpop.f32.mrf.mxu0  ;;  %v3582_v40 = vpop.f32.mrf.mxu1 }
 0x46b   : > { %v3535_v41 = vadd.f32 %v3534_v39, %v3533_v36  ;;  %v3583_v42 = vadd.f32 %v3582_v40, %v3581_v37 }
 0x46c   : > { %v3536_v43 = vpop.f32.mrf.mxu0  ;;  %v3584_v44 = vpop.f32.mrf.mxu1 }
 0x46d   : > { %v2428_v45 = vadd.f32 %v3535_v41, %v4405_v38  ;;  %v2492_v61 = vadd.f32 %v3583_v42, %v4405_v38 }
 0x46e   : > { %v3537_v46 = vpop.f32.mrf.mxu0  ;;  %v3585_v47 = vpop.f32.mrf.mxu1 }
 0x46f   : > { %v2554_v48 = vmax.f32 %v2428_v45, 0.0  ;;  %v2570_v49 = vmax.f32 %v2492_v61, 0.0  ;;  %v3538_v50 = vadd.f32 %v3537_v46, %v3536_v43  ;;  %v3586_v51 = vadd.f32 %v3585_v47, %v3584_v44 }
 0x470   : > { %v3539_v52 = vpop.f32.mrf.mxu0  ;;  %v3587_v53 = vpop.f32.mrf.mxu1 }
 0x471   : > { %2586 = vst [vmem:[#allocation13] sm:$0xff] %v2554_v48  ;;  %2602 = vst [vmem:[#allocation13 + $0x80] sm:$0xff] %v2570_v49  ;;  %v2431_v54 = vadd.f32 %v3538_v50, %v4405_v38  ;;  %v2495_v55 = vadd.f32 %v3586_v51, %v4405_v38 }
 0x472   : > { %v3540_v56 = vpop.f32.mrf.mxu0  ;;  %v3588_v57 = vpop.f32.mrf.mxu1 }
 0x473   : > { %v2555_v58 = vmax.f32 %v2431_v54, 0.0  ;;  %v2571_v59 = vmax.f32 %v2495_v55, 0.0  ;;  %v3541_v60 = vadd.f32 %v3540_v56, %v3539_v52  ;;  %v3589_v62 = vadd.f32 %v3588_v57, %v3587_v53 }
 0x474   : > { %v3542_v63 = vpop.f32.mrf.mxu0  ;;  %v3590_v0 = vpop.f32.mrf.mxu1 }
 0x475   : > { %2587 = vst [vmem:[#allocation13 + $0x8] sm:$0xff] %v2555_v58  ;;  %2603 = vst [vmem:[#allocation13 + $0x88] sm:$0xff] %v2571_v59  ;;  %v2436_v1 = vadd.f32 %v3541_v60, %v4405_v38  ;;  %v2500_v2 = vadd.f32 %v3589_v62, %v4405_v38 }
 0x476   : > { %v3543_v3 = vpop.f32.mrf.mxu0  ;;  %v3591_v4 = vpop.f32.mrf.mxu1 }
 0x477   : > { %v2556_v5 = vmax.f32 %v2436_v1, 0.0  ;;  %v2572_v6 = vmax.f32 %v2500_v2, 0.0  ;;  %v3544_v7 = vadd.f32 %v3543_v3, %v3542_v63  ;;  %v3592_v8 = vadd.f32 %v3591_v4, %v3590_v0 }
 0x478   : > { %v3545_v9 = vpop.f32.mrf.mxu0  ;;  %v3593_v10 = vpop.f32.mrf.mxu1 }
 0x479   : > { %2588 = vst [vmem:[#allocation13 + $0x10] sm:$0xff] %v2556_v5  ;;  %2604 = vst [vmem:[#allocation13 + $0x90] sm:$0xff] %v2572_v6  ;;  %v2439_v11 = vadd.f32 %v3544_v7, %v4405_v38  ;;  %v2503_v12 = vadd.f32 %v3592_v8, %v4405_v38 }
 0x47a   : > { %v3546_v13 = vpop.f32.mrf.mxu0  ;;  %v3594_v14 = vpop.f32.mrf.mxu1 }
 0x47b   : > { %v2557_v15 = vmax.f32 %v2439_v11, 0.0  ;;  %v2573_v16 = vmax.f32 %v2503_v12, 0.0  ;;  %v3547_v17 = vadd.f32 %v3546_v13, %v3545_v9  ;;  %v3595_v18 = vadd.f32 %v3594_v14, %v3593_v10 }
 0x47c   : > { %v3548_v19 = vpop.f32.mrf.mxu0  ;;  %v3596_v20 = vpop.f32.mrf.mxu1 }
 0x47d   : > { %2589 = vst [vmem:[#allocation13 + $0x18] sm:$0xff] %v2557_v15  ;;  %2605 = vst [vmem:[#allocation13 + $0x98] sm:$0xff] %v2573_v16  ;;  %v2444_v21 = vadd.f32 %v3547_v17, %v4405_v38  ;;  %v2508_v22 = vadd.f32 %v3595_v18, %v4405_v38 }
 0x47e   : > { %v3549_v23 = vpop.f32.mrf.mxu0  ;;  %v3597_v24 = vpop.f32.mrf.mxu1 }
 0x47f   : > { %v2558_v25 = vmax.f32 %v2444_v21, 0.0  ;;  %v2574_v26 = vmax.f32 %v2508_v22, 0.0  ;;  %v3550_v27 = vadd.f32 %v3549_v23, %v3548_v19  ;;  %v3598_v28 = vadd.f32 %v3597_v24, %v3596_v20 }
 0x480   : > { %v3551_v29 = vpop.f32.mrf.mxu0  ;;  %v3599_v30 = vpop.f32.mrf.mxu1 }
 0x481   : > { %2590 = vst [vmem:[#allocation13 + $0x20] sm:$0xff] %v2558_v25  ;;  %2606 = vst [vmem:[#allocation13 + $0xa0] sm:$0xff] %v2574_v26  ;;  %v2447_v31 = vadd.f32 %v3550_v27, %v4405_v38  ;;  %v2511_v32 = vadd.f32 %v3598_v28, %v4405_v38 }
 0x482   : > { %v3552_v33 = vpop.f32.mrf.mxu0  ;;  %v3600_v34 = vpop.f32.mrf.mxu1 }
 0x483   : > { %v2559_v35 = vmax.f32 %v2447_v31, 0.0  ;;  %v2575_v36 = vmax.f32 %v2511_v32, 0.0  ;;  %v3553_v37 = vadd.f32 %v3552_v33, %v3551_v29  ;;  %v3601_v39 = vadd.f32 %v3600_v34, %v3599_v30 }
 0x484   : > { %v3554_v40 = vpop.f32.mrf.mxu0  ;;  %v3602_v41 = vpop.f32.mrf.mxu1 }
 0x485   : > { %2591 = vst [vmem:[#allocation13 + $0x28] sm:$0xff] %v2559_v35  ;;  %2607 = vst [vmem:[#allocation13 + $0xa8] sm:$0xff] %v2575_v36  ;;  %v2452_v42 = vadd.f32 %v3553_v37, %v4405_v38  ;;  %v2516_v43 = vadd.f32 %v3601_v39, %v4405_v38 }
 0x486   : > { %v3555_v44 = vpop.f32.mrf.mxu0  ;;  %v3603_v45 = vpop.f32.mrf.mxu1 }
 0x487   : > { %v2560_v61 = vmax.f32 %v2452_v42, 0.0  ;;  %v2576_v46 = vmax.f32 %v2516_v43, 0.0  ;;  %v3556_v47 = vadd.f32 %v3555_v44, %v3554_v40  ;;  %v3604_v48 = vadd.f32 %v3603_v45, %v3602_v41 }
 0x488   : > { %v3557_v49 = vpop.f32.mrf.mxu0  ;;  %v3605_v50 = vpop.f32.mrf.mxu1 }
 0x489   : > { %2592 = vst [vmem:[#allocation13 + $0x30] sm:$0xff] %v2560_v61  ;;  %2608 = vst [vmem:[#allocation13 + $0xb0] sm:$0xff] %v2576_v46  ;;  %v2455_v51 = vadd.f32 %v3556_v47, %v4405_v38  ;;  %v2519_v52 = vadd.f32 %v3604_v48, %v4405_v38 }
 0x48a   : > { %v3558_v53 = vpop.f32.mrf.mxu0  ;;  %v3606_v54 = vpop.f32.mrf.mxu1 }
 0x48b   : > { %v2561_v55 = vmax.f32 %v2455_v51, 0.0  ;;  %v2577_v56 = vmax.f32 %v2519_v52, 0.0  ;;  %v3559_v57 = vadd.f32 %v3558_v53, %v3557_v49  ;;  %v3607_v58 = vadd.f32 %v3606_v54, %v3605_v50 }
 0x48c   : > { %v3560_v59 = vpop.f32.mrf.mxu0  ;;  %v3608_v60 = vpop.f32.mrf.mxu1 }
 0x48d   : > { %2593 = vst [vmem:[#allocation13 + $0x38] sm:$0xff] %v2561_v55  ;;  %2609 = vst [vmem:[#allocation13 + $0xb8] sm:$0xff] %v2577_v56  ;;  %v2460_v62 = vadd.f32 %v3559_v57, %v4405_v38  ;;  %v2524_v63 = vadd.f32 %v3607_v58, %v4405_v38 }
 0x48e   : > { %v3561_v0 = vpop.f32.mrf.mxu0  ;;  %v3609_v1 = vpop.f32.mrf.mxu1 }
 0x48f   : > { %v2562_v2 = vmax.f32 %v2460_v62, 0.0  ;;  %v2578_v3 = vmax.f32 %v2524_v63, 0.0  ;;  %v3562_v4 = vadd.f32 %v3561_v0, %v3560_v59  ;;  %v3610_v5 = vadd.f32 %v3609_v1, %v3608_v60 }
 0x490   : > { %v3563_v6 = vpop.f32.mrf.mxu0  ;;  %v3611_v7 = vpop.f32.mrf.mxu1 }
 0x491   : > { %2594 = vst [vmem:[#allocation13 + $0x40] sm:$0xff] %v2562_v2  ;;  %2610 = vst [vmem:[#allocation13 + $0xc0] sm:$0xff] %v2578_v3  ;;  %v2463_v8 = vadd.f32 %v3562_v4, %v4405_v38  ;;  %v2527_v9 = vadd.f32 %v3610_v5, %v4405_v38 }
 0x492   : > { %v3564_v10 = vpop.f32.mrf.mxu0  ;;  %v3612_v11 = vpop.f32.mrf.mxu1 }
 0x493   : > { %v2563_v12 = vmax.f32 %v2463_v8, 0.0  ;;  %v2579_v13 = vmax.f32 %v2527_v9, 0.0  ;;  %v3565_v14 = vadd.f32 %v3564_v10, %v3563_v6  ;;  %v3613_v15 = vadd.f32 %v3612_v11, %v3611_v7 }
 0x494   : > { %v3566_v16 = vpop.f32.mrf.mxu0  ;;  %v3614_v17 = vpop.f32.mrf.mxu1 }
 0x495   : > { %2595 = vst [vmem:[#allocation13 + $0x48] sm:$0xff] %v2563_v12  ;;  %2611 = vst [vmem:[#allocation13 + $0xc8] sm:$0xff] %v2579_v13  ;;  %v2468_v18 = vadd.f32 %v3565_v14, %v4405_v38  ;;  %v2532_v19 = vadd.f32 %v3613_v15, %v4405_v38 }
 0x496   : > { %v3567_v20 = vpop.f32.mrf.mxu0  ;;  %v3615_v21 = vpop.f32.mrf.mxu1 }
 0x497   : > { %v2564_v22 = vmax.f32 %v2468_v18, 0.0  ;;  %v2580_v23 = vmax.f32 %v2532_v19, 0.0  ;;  %v3568_v24 = vadd.f32 %v3567_v20, %v3566_v16  ;;  %v3616_v25 = vadd.f32 %v3615_v21, %v3614_v17 }
 0x498   : > { %v3569_v26 = vpop.f32.mrf.mxu0  ;;  %v3617_v27 = vpop.f32.mrf.mxu1 }
 0x499   : > { %2596 = vst [vmem:[#allocation13 + $0x50] sm:$0xff] %v2564_v22  ;;  %2612 = vst [vmem:[#allocation13 + $0xd0] sm:$0xff] %v2580_v23  ;;  %v2471_v28 = vadd.f32 %v3568_v24, %v4405_v38  ;;  %v2535_v29 = vadd.f32 %v3616_v25, %v4405_v38 }
 0x49a   : > { %v3570_v30 = vpop.f32.mrf.mxu0  ;;  %v3618_v31 = vpop.f32.mrf.mxu1 }
 0x49b   : > { %v2565_v32 = vmax.f32 %v2471_v28, 0.0  ;;  %v2581_v33 = vmax.f32 %v2535_v29, 0.0  ;;  %v3571_v34 = vadd.f32 %v3570_v30, %v3569_v26  ;;  %v3619_v35 = vadd.f32 %v3618_v31, %v3617_v27 }
 0x49c   : > { %v3572_v36 = vpop.f32.mrf.mxu0  ;;  %v3620_v37 = vpop.f32.mrf.mxu1 }
 0x49d   : > { %2597 = vst [vmem:[#allocation13 + $0x58] sm:$0xff] %v2565_v32  ;;  %2613 = vst [vmem:[#allocation13 + $0xd8] sm:$0xff] %v2581_v33  ;;  %v2476_v39 = vadd.f32 %v3571_v34, %v4405_v38  ;;  %v2540_v40 = vadd.f32 %v3619_v35, %v4405_v38 }
 0x49e   : > { %v3573_v41 = vpop.f32.mrf.mxu0  ;;  %v3621_v42 = vpop.f32.mrf.mxu1 }
 0x49f   : > { %v2566_v43 = vmax.f32 %v2476_v39, 0.0  ;;  %v2582_v44 = vmax.f32 %v2540_v40, 0.0  ;;  %v3574_v45 = vadd.f32 %v3573_v41, %v3572_v36  ;;  %v3622_v61 = vadd.f32 %v3621_v42, %v3620_v37 }
 0x4a0   : > { %v3575_v46 = vpop.f32.mrf.mxu0  ;;  %v3623_v47 = vpop.f32.mrf.mxu1 }
 0x4a1   : > { %2598 = vst [vmem:[#allocation13 + $0x60] sm:$0xff] %v2566_v43  ;;  %2614 = vst [vmem:[#allocation13 + $0xe0] sm:$0xff] %v2582_v44  ;;  %v2479_v48 = vadd.f32 %v3574_v45, %v4405_v38  ;;  %v2543_v49 = vadd.f32 %v3622_v61, %v4405_v38 }
 0x4a2   : > { %v3576_v50 = vpop.f32.mrf.mxu0  ;;  %v3624_v51 = vpop.f32.mrf.mxu1 }
 0x4a3   : > { %v2567_v52 = vmax.f32 %v2479_v48, 0.0  ;;  %v2583_v53 = vmax.f32 %v2543_v49, 0.0  ;;  %v3577_v54 = vadd.f32 %v3576_v50, %v3575_v46  ;;  %v3625_v55 = vadd.f32 %v3624_v51, %v3623_v47 }
 0x4a4   : > { %v3578_v56 = vpop.f32.mrf.mxu0  ;;  %v3626_v57 = vpop.f32.mrf.mxu1 }
 0x4a5   : > { %2599 = vst [vmem:[#allocation13 + $0x68] sm:$0xff] %v2567_v52  ;;  %2615 = vst [vmem:[#allocation13 + $0xe8] sm:$0xff] %v2583_v53  ;;  %v2484_v58 = vadd.f32 %v3577_v54, %v4405_v38  ;;  %v2548_v59 = vadd.f32 %v3625_v55, %v4405_v38 }
 0x4a6   : > { %v3579_v60 = vpop.f32.mrf.mxu0  ;;  %v3627_v62 = vpop.f32.mrf.mxu1 }
 0x4a7   : > { %v2568_v63 = vmax.f32 %v2484_v58, 0.0  ;;  %v2584_v0 = vmax.f32 %v2548_v59, 0.0  ;;  %v3580_v1 = vadd.f32 %v3579_v60, %v3578_v56  ;;  %v3628_v2 = vadd.f32 %v3627_v62, %v3626_v57 }
 0x4a9   : > { %2600 = vst [vmem:[#allocation13 + $0x70] sm:$0xff] %v2568_v63  ;;  %2616 = vst [vmem:[#allocation13 + $0xf0] sm:$0xff] %v2584_v0  ;;  %v2487_v3 = vadd.f32 %v3580_v1, %v4405_v38  ;;  %v2551_v4 = vadd.f32 %v3628_v2, %v4405_v38 }
 0x4ab   : > { %v2569_v5 = vmax.f32 %v2487_v3, 0.0  ;;  %v2585_v6 = vmax.f32 %v2551_v4, 0.0 }
 0x4ad   : > { %2601 = vst [vmem:[#allocation13 + $0x78] sm:$0xff] %v2569_v5  ;;  %2617 = vst [vmem:[#allocation13 + $0xf8] sm:$0xff] %v2585_v6 }
 0x4ae PF: > { %p4441_p4 = scmp.eq.s32.totalorder %s2713_s26, 1  ;;  %s4221_s12 = smov [#allocation13]  }
 0x4af   : > { %s2627_s16 = sshll.u32 %s4221_s12, 4  ;;  %s2628_s16 = int_to_ptr.vmem [resolvable:$true] %s2627_s16 }
 0x4b0   : > { %s4148_s17 = scalar_lea.vmem %s2628_s16, 4096  ;;  %p4155_p11 = scmp.lt.s32.totalorder %s2628_s16, %s2628_s16 }
 0x4b1   : > { %p4149_p8 = scmp.ne.s32.totalorder %s2628_s16, %s4148_s17  ;;  %p4156_p12 = scmp.lt.s32.totalorder %s4148_s17, %s4148_s17 }
 0x4b3   : > { %p4150_p9 = pnand %p4149_p8, %p4441_p4  ;;  %p4157_p6 = por %p4156_p12, %p4155_p11 }
 0x4b5   : > { %p4151_p10 = pneg %p4150_p9 }
 0x4b7   : > { %p4158_p13 = pnand %p4157_p6, %p4151_p10 }
 0x4b9   : > { %4161 = shalt.err (!%p4158_p13)
}
 0x4ba   : > { %s4222_s18 = smov 128   ;;  %s4223_s26 = smov 8  }
 0x4bb   : > { %3806 = dma.vmem_to_hbm [thread:$0]  (%p4441_p4), %s2628_s16, 4096, %s4471_s6, [#allocation7], %s4222_s18, %s4222_s18, %s4223_s26  }
 0x4bc   : > { %4197 = dma.done.wait (%p4441_p4), [#allocation7], 4096  }
 0x4bd   : > { %4199 = vsyncadd (%p4441_p4), [#allocation7], 4294963200 }
 0x4be PF: > { %s20_s23 = sadd.s32 1, %s4210_s23   ;;  %s4477_s21 = smov %s4206_s22 }
 0x4bf   : > { %p17_p0 = scmp.ge.s32.totalorder %s20_s23, 4   ;;  %s4478_s22 = smov %s4480_s30 }
 0x4c1   :  { %19 = sbr.rel (!%p17_p0) target bundleno = 5 (0x5), region = 104 }
 0x4c6   :  { %2643 = vsyncpa [#allocation6], 1 }
 0x4c7   :  { %2645 = vsyncpa [#allocation6 + $0x1], 1 }
 0x4c8   :  { %2646 = vsyncpa [#allocation9], 1 }
 0x4c9   :  { %2647 = vsyncpa [#allocation12], 1 }
 0x4ca   :  { %2648 = vsyncpa [#allocation7], 1 }
 0x4cb   :  { %2650 = vsyncpa [#allocation7 + $0x1], 1 }

</bundles_post_ra>
